<compile_context>
chip_gen: v7x
topology: tpu7x:2x2x1
jax: 0.10.0
libtpu: 0.0.40
codegen_flags: <defaults>
</compile_context>

<pallas_src>
import functools

import jax
import jax.numpy as jnp
import numpy as np
from jax.experimental import pallas as pl
from jax.experimental.pallas import tpu as pltpu


# ------------------------------ tiling utils ------------------------------ #
def _round_up(x, m):
    return ((x + m - 1) // m) * m


def _pick_tile(dim, unit, max_tile):
    """(tile, padded_dim): tile % unit == 0, padded_dim % tile == 0 (ceil-split)."""
    p = _round_up(dim, unit)
    if p <= max_tile:
        return p, p
    steps = -(-p // max_tile)
    tile = _round_up(-(-p // steps), unit)
    return tile, tile * steps


def _pick_tile_exact(dim, unit, max_tile):
    """Largest tile (multiple of `unit`, <= max_tile) that exactly divides
    round_up(dim, unit) -> minimal zero-padding on the reduction axis."""
    p = _round_up(dim, unit)
    n_units = p // unit
    max_d = max(1, max_tile // unit)
    best = 1
    for d in range(1, min(n_units, max_d) + 1):
        if n_units % d == 0:
            best = d
    return best * unit, p


def _default_vmem_limit():
    """Generation-aware VMEM budget (v5e/v6e 128 MiB, v7x 64 MiB physical)."""
    try:
        cap = pltpu.get_tpu_info().vmem_capacity_bytes
        return int(min(cap // 2, 64 * 1024 * 1024))
    except Exception:  # no TPU info available -> conservative default
        return 32 * 1024 * 1024


_VMEM_LIMIT = _default_vmem_limit()


# ----------------------------- Pallas kernels ------------------------------ #
def _gemm_bias_act_kernel(x_ref, w_ref, b_ref, o_ref, acc_ref, *, relu):
    """General path: K split over the last (reduction) grid axis."""
    k = pl.program_id(2)

    @pl.when(k == 0)
    def _init():
        acc_ref[...] = jnp.broadcast_to(b_ref[...], acc_ref.shape)

    acc_ref[...] += jnp.dot(
        x_ref[...], w_ref[...], preferred_element_type=jnp.float32
    )

    @pl.when(k == pl.num_programs(2) - 1)
    def _finalize():
        out = acc_ref[...]
        if relu:
            out = jnp.maximum(out, 0.0)
        o_ref[...] = out.astype(o_ref.dtype)


def _gemm_bias_act_single_k_kernel(x_ref, w_ref, b_ref, o_ref, *, relu):
    """Single-K-step specialization: no accumulator scratch, no pl.when."""
    out = jnp.dot(x_ref[...], w_ref[...], preferred_element_type=jnp.float32)
    out = out + b_ref[...]
    if relu:
        out = jnp.maximum(out, 0.0)
    o_ref[...] = out.astype(o_ref.dtype)


def _fc_head_fused_kernel(x_ref, w1_ref, b1_ref, w2_ref, b2_ref, o_ref, acc_ref):
    """q = relu(x @ w1 + b1) @ w2 + b2 fused: fc2 applied in fc1's finalize."""
    k = pl.program_id(1)

    @pl.when(k == 0)
    def _init():
        acc_ref[...] = jnp.broadcast_to(b1_ref[...], acc_ref.shape)

    acc_ref[...] += jnp.dot(
        x_ref[...], w1_ref[...], preferred_element_type=jnp.float32
    )

    @pl.when(k == pl.num_programs(1) - 1)
    def _finalize():
        h = jnp.maximum(acc_ref[...], 0.0).astype(jnp.bfloat16)
        q = jnp.dot(h, w2_ref[...], preferred_element_type=jnp.float32)
        o_ref[...] = (q + b2_ref[...]).astype(o_ref.dtype)


# ----------------------------- GEMM wrappers ------------------------------- #
def pallas_linear(x, w, b, *, relu, out_dtype=jnp.float32):
    """y = relu?(x @ w + b). x:(M,K), w:(K,N), b:(N,) -> (M,N) out_dtype.

    bf16 MXU inputs (cast BEFORE padding so pads are half-width), f32
    accumulation; M/K/N padded to tile multiples, result sliced back.
    """
    M, K = x.shape
    K2, N = w.shape
    assert K == K2, (K, K2)

    TM, Mp = _pick_tile(M, 16, 512)          # activation rows (bf16 sublanes)
    TN, Np = _pick_tile(N, 128, 256)         # lane dim -> dense vst
    TK, Kp = _pick_tile_exact(K, 128, 1024)  # minimal-pad K tiling

    x = x.astype(jnp.bfloat16)
    w = w.astype(jnp.bfloat16)
    xp = x if (Mp, Kp) == (M, K) else jnp.pad(x, ((0, Mp - M), (0, Kp - K)))
    wp = w if (Kp, Np) == (K, N) else jnp.pad(w, ((0, Kp - K), (0, Np - N)))
    bp = (b if Np == N else jnp.pad(b, (0, Np - N)))
    bp = bp.reshape(1, Np).astype(jnp.float32)

    out_bytes = jnp.dtype(out_dtype).itemsize
    cost = pl.CostEstimate(
        flops=2 * Mp * Np * Kp,
        transcendentals=0,
        bytes_accessed=(Mp * Kp + Kp * Np) * 2 + Np * 4 + Mp * Np * out_bytes,
    )

    n_k = Kp // TK
    if n_k == 1:
        # Single K step: no accumulator, no phase predicates.
        kernel = functools.partial(_gemm_bias_act_single_k_kernel, relu=relu)
        out = pl.pallas_call(
            kernel,
            out_shape=jax.ShapeDtypeStruct((Mp, Np), out_dtype),
            grid_spec=pltpu.PrefetchScalarGridSpec(
                num_scalar_prefetch=0,
                grid=(Mp // TM, Np // TN),
                in_specs=[
                    pl.BlockSpec((TM, Kp), lambda i, j: (i, 0)),
                    pl.BlockSpec((Kp, TN), lambda i, j: (0, j)),
                    pl.BlockSpec((1, TN), lambda i, j: (0, j)),
                ],
                out_specs=pl.BlockSpec((TM, TN), lambda i, j: (i, j)),
            ),
            compiler_params=pltpu.CompilerParams(
                dimension_semantics=("parallel", "parallel"),
                vmem_limit_bytes=_VMEM_LIMIT,
            ),
            cost_estimate=cost,
        )(xp, wp, bp)
    else:
        kernel = functools.partial(_gemm_bias_act_kernel, relu=relu)
        out = pl.pallas_call(
            kernel,
            out_shape=jax.ShapeDtypeStruct((Mp, Np), out_dtype),
            grid_spec=pltpu.PrefetchScalarGridSpec(
                num_scalar_prefetch=0,
                grid=(Mp // TM, Np // TN, n_k),
                in_specs=[
                    pl.BlockSpec((TM, TK), lambda i, j, k: (i, k)),
                    pl.BlockSpec((TK, TN), lambda i, j, k: (k, j)),
                    pl.BlockSpec((1, TN), lambda i, j, k: (0, j)),
                ],
                out_specs=pl.BlockSpec((TM, TN), lambda i, j, k: (i, j)),
                scratch_shapes=[pltpu.VMEM((TM, TN), jnp.float32)],
            ),
            compiler_params=pltpu.CompilerParams(
                dimension_semantics=("parallel", "parallel", "arbitrary"),
                vmem_limit_bytes=_VMEM_LIMIT,
            ),
            cost_estimate=cost,
        )(xp, wp, bp)

    if (Mp, Np) != (M, N):
        out = out[:M, :N]
    return out


def pallas_fc_head(x, w1, b1, w2, b2):
    """Fused FC tail: q = relu(x @ w1 + b1) @ w2 + b2, one pallas_call.

    x:(M,K) bf16, w1:(K,H) bf16, w2:(H,A) bf16 -> (M,A) f32.  The hidden
    activation lives only in a VMEM accumulator (never written to HBM).
    """
    M, K = x.shape
    K2, H = w1.shape
    H2, A = w2.shape
    assert K == K2 and H == H2

    TM, Mp = _pick_tile(M, 16, 256)
    TK, Kp = _pick_tile_exact(K, 128, 1024)   # fc1: 3136 -> 3200 / 640
    Hp = _round_up(H, 128)
    Ap = _round_up(A, 128)

    x = x.astype(jnp.bfloat16)
    w1 = w1.astype(jnp.bfloat16)
    w2 = w2.astype(jnp.bfloat16)
    xp = x if (Mp, Kp) == (M, K) else jnp.pad(x, ((0, Mp - M), (0, Kp - K)))
    w1p = w1 if (Kp, Hp) == (K, H) else jnp.pad(w1, ((0, Kp - K), (0, Hp - H)))
    w2p = w2 if (Hp, Ap) == (H, A) else jnp.pad(w2, ((0, Hp - H), (0, Ap - A)))
    b1p = (b1 if Hp == H else jnp.pad(b1, (0, Hp - H))).reshape(1, Hp).astype(jnp.float32)
    b2p = (b2 if Ap == A else jnp.pad(b2, (0, Ap - A))).reshape(1, Ap).astype(jnp.float32)

    out = pl.pallas_call(
        _fc_head_fused_kernel,
        out_shape=jax.ShapeDtypeStruct((Mp, Ap), jnp.float32),
        grid_spec=pltpu.PrefetchScalarGridSpec(
            num_scalar_prefetch=0,
            grid=(Mp // TM, Kp // TK),
            in_specs=[
                pl.BlockSpec((TM, TK), lambda i, k: (i, k)),
                pl.BlockSpec((TK, Hp), lambda i, k: (k, 0)),
                pl.BlockSpec((1, Hp), lambda i, k: (0, 0)),
                pl.BlockSpec((Hp, Ap), lambda i, k: (0, 0)),
                pl.BlockSpec((1, Ap), lambda i, k: (0, 0)),
            ],
            out_specs=pl.BlockSpec((TM, Ap), lambda i, k: (i, 0)),
            scratch_shapes=[pltpu.VMEM((TM, Hp), jnp.float32)],
        ),
        compiler_params=pltpu.CompilerParams(
            dimension_semantics=("parallel", "arbitrary"),
            vmem_limit_bytes=_VMEM_LIMIT,
        ),
        cost_estimate=pl.CostEstimate(
            flops=2 * Mp * (Kp * Hp + Hp * Ap),
            transcendentals=0,
            bytes_accessed=(Mp * Kp + Kp * Hp + Hp * Ap) * 2
            + (Hp + Ap) * 4 + Mp * Ap * 4,
        ),
    )(xp, w1p, b1p, w2p, b2p)

    if (Mp, Ap) != (M, A):
        out = out[:M, :A]
    return out


# --------------------------- conv via patches+GEMM ------------------------- #
# TODO(synk): the remaining HBM round trip is the patch array itself; fully
# fusing the patch gather into the Pallas GEMM (extra kh*kw grid axis with
# strided in-kernel loads) is possible but left out for lowering robustness.
def conv2d_relu_nhwc(x, w_mat, b, kh, kw, stride):
    """x:(B,H,W,Cin) NHWC bf16, w_mat:(KH*KW*Cin, Cout) in the patch-column
    order of conv_general_dilated_patches (pre-permuted). VALID padding."""
    B = x.shape[0]
    cout = w_mat.shape[1]
    patches = jax.lax.conv_general_dilated_patches(
        x, (kh, kw), (stride, stride), "VALID",
        dimension_numbers=("NHWC", "HWIO", "NHWC"),
    )                                                   # (B, OH, OW, K) bf16
    _, oh, ow, K = patches.shape
    cols = patches.reshape(B * oh * ow, K)
    y = pallas_linear(cols, w_mat, b, relu=True, out_dtype=jnp.bfloat16)
    return y.reshape(B, oh, ow, cout)                   # NHWC bf16


# ------------------------------ DQN module --------------------------------- #
def _conv_out_dim(d, k, s):
    return (d - k) // s + 1


def init_params(key, action_size, state_size):
    """PyTorch-layout params, uniform(-1/sqrt(fan_in), +) like nn defaults."""
    c_in, h, w = state_size
    keys = jax.random.split(key, 10)

    def u(k, shape, fan_in):
        bound = 1.0 / np.sqrt(fan_in)
        return jax.random.uniform(k, shape, jnp.float32, -bound, bound)

    params = {
        "conv1_w": u(keys[0], (32, c_in, 8, 8), c_in * 8 * 8),
        "conv1_b": u(keys[1], (32,), c_in * 8 * 8),
        "conv2_w": u(keys[2], (64, 32, 4, 4), 32 * 4 * 4),
        "conv2_b": u(keys[3], (64,), 32 * 4 * 4),
        "conv3_w": u(keys[4], (64, 64, 3, 3), 64 * 3 * 3),
        "conv3_b": u(keys[5], (64,), 64 * 3 * 3),
    }
    ho = _conv_out_dim(_conv_out_dim(_conv_out_dim(h, 8, 4), 4, 2), 3, 1)
    wo = _conv_out_dim(_conv_out_dim(_conv_out_dim(w, 8, 4), 4, 2), 3, 1)
    conv_out = 64 * ho * wo
    params["fc1_w"] = u(keys[6], (512, conv_out), conv_out)
    params["fc1_b"] = u(keys[7], (512,), conv_out)
    params["fc2_w"] = u(keys[8], (action_size, 512), 512)
    params["fc2_b"] = u(keys[9], (action_size,), 512)
    return params


def _patch_perm(c_in, kh, kw):
    """For each patch column k of conv_general_dilated_patches, the PyTorch
    (Cin,KH,KW)-flat index it contains.  Determined numerically (robust to the
    op's internal channel ordering); values kept <= max(c_in, kh*kw) so the
    probe is exact in any matmul precision."""
    def run(vals_chw):
        x = jnp.asarray(vals_chw.transpose(1, 2, 0)[None], jnp.float32)  # NHWC
        out = jax.lax.conv_general_dilated_patches(
            x, (kh, kw), (1, 1), "VALID",
            dimension_numbers=("NHWC", "HWIO", "NHWC"),
            precision=jax.lax.Precision.HIGHEST,
        )
        return np.rint(np.asarray(out)).astype(np.int64).reshape(-1)

    c_idx = np.broadcast_to(np.arange(c_in, dtype=np.float32)[:, None, None],
                            (c_in, kh, kw))
    s_idx = np.broadcast_to(
        np.arange(kh * kw, dtype=np.float32).reshape(1, kh, kw), (c_in, kh, kw))
    perm = run(c_idx) * (kh * kw) + run(s_idx)
    assert sorted(perm.tolist()) == list(range(c_in * kh * kw)), "bad patch perm"
    return perm


def prepare_params(params, state_size):
    """One-time weight layout prep: all transposes/permutes/bf16 casts here."""
    c_in, h, w = state_size

    def conv_mat(wt, kh, kw):
        cout, cin = wt.shape[0], wt.shape[1]
        perm = _patch_perm(cin, kh, kw)
        # (Cout, Cin*KH*KW) columns reordered to the patch-column order, then
        # transposed to the GEMM's (K, Cout) layout.  Pre-cast to bf16.
        return jnp.asarray(wt).reshape(cout, -1)[:, perm].T.astype(jnp.bfloat16)

    ho = _conv_out_dim(_conv_out_dim(_conv_out_dim(h, 8, 4), 4, 2), 3, 1)
    wo = _conv_out_dim(_conv_out_dim(_conv_out_dim(w, 8, 4), 4, 2), 3, 1)
    conv_out = 64 * ho * wo
    # NHWC-flatten position p -> NCHW-flatten index, so fc1 numerics match torch.
    perm_fc = np.arange(conv_out).reshape(64, ho, wo).transpose(1, 2, 0).reshape(-1)

    return {
        "conv1_w": conv_mat(params["conv1_w"], 8, 8), "conv1_b": params["conv1_b"],
        "conv2_w": conv_mat(params["conv2_w"], 4, 4), "conv2_b": params["conv2_b"],
        "conv3_w": conv_mat(params["conv3_w"], 3, 3), "conv3_b": params["conv3_b"],
        "fc1_w": params["fc1_w"][:, perm_fc].T.astype(jnp.bfloat16),  # (conv_out,512)
        "fc1_b": params["fc1_b"],
        "fc2_w": params["fc2_w"].T.astype(jnp.bfloat16),              # (512, A)
        "fc2_b": params["fc2_b"],
    }


def dqn_forward(kp, x):
    """x: (B, C, H, W) float32 (PyTorch layout) -> q-values (B, num_actions)."""
    x = jnp.transpose(x, (0, 2, 3, 1)).astype(jnp.bfloat16)   # NHWC + bf16 once
    x = conv2d_relu_nhwc(x, kp["conv1_w"], kp["conv1_b"], 8, 8, 4)
    x = conv2d_relu_nhwc(x, kp["conv2_w"], kp["conv2_b"], 4, 4, 2)
    x = conv2d_relu_nhwc(x, kp["conv3_w"], kp["conv3_b"], 3, 3, 1)
    flat = x.reshape(x.shape[0], -1)          # NHWC flatten (fc1_w pre-permuted)
    return pallas_fc_head(flat, kp["fc1_w"], kp["fc1_b"],
                          kp["fc2_w"], kp["fc2_b"])


# ------------------------------ reference ---------------------------------- #
def ref_forward(params, x):
    def conv(x, w, b, s):
        y = jax.lax.conv_general_dilated(
            x, w, (s, s), "VALID",
            dimension_numbers=("NCHW", "OIHW", "NCHW"))
        return jax.nn.relu(y + b[None, :, None, None])

    x = conv(x, params["conv1_w"], params["conv1_b"], 4)
    x = conv(x, params["conv2_w"], params["conv2_b"], 2)
    x = conv(x, params["conv3_w"], params["conv3_b"], 1)
    flat = x.reshape(x.shape[0], -1)
    h = jax.nn.relu(flat @ params["fc1_w"].T + params["fc1_b"])
    return h @ params["fc2_w"].T + params["fc2_b"]


# TODO(synk): DQN.act() (epsilon-greedy host-side randomness) is policy glue,
# not part of the forward-pass kernel; only forward() is implemented here.

if __name__ == "__main__":
    key = jax.random.PRNGKey(0)
    k_param, k_x = jax.random.split(key)

    # Small but valid shapes for the 8/4 -> 4/2 -> 3/1 conv stack:
    # 36 -> 8 -> 3 -> 1 spatial, so conv_out_size = 64.
    batch, action_size = 2, 6
    state_size = (4, 36, 36)

    params = init_params(k_param, action_size, state_size)
    kparams = prepare_params(params, state_size)
    x = jax.random.normal(k_x, (batch,) + state_size, dtype=jnp.float32)

    fwd = jax.jit(dqn_forward)
    q = jax.block_until_ready(fwd(kparams, x))
    q_ref = jax.block_until_ready(ref_forward(params, x))

    assert q.shape == (batch, action_size), q.shape
    np.testing.assert_allclose(np.asarray(q), np.asarray(q_ref),
                               rtol=2e-2, atol=2e-2)
    print("KERNEL_OK")
</pallas_src>

<mosaic_0001>
module attributes {stable_mosaic.version = 11 : i64} {
  func.func @_gemm_bias_act_single_k_kernel(%arg0: i32, %arg1: i32, %arg2: memref<128x256xbf16, #tpu.memory_space<vmem>>, %arg3: memref<256x128xbf16, #tpu.memory_space<vmem>>, %arg4: memref<1x128xf32, #tpu.memory_space<vmem>>, %arg5: memref<128x128xbf16, #tpu.memory_space<vmem>>) attributes {dimension_semantics = [#tpu.dimension_semantics<parallel>, #tpu.dimension_semantics<parallel>], iteration_bounds = array<i64: 1, 1>, scalar_prefetch = 0 : i64, scratch_operands = 0 : i64, tpu.core_type = #tpu.core_type<tc>, window_params = [{transform_indices = @transform_0, window_bounds = array<i64: 128, 256>}, {transform_indices = @transform_1, window_bounds = array<i64: 256, 128>}, {transform_indices = @transform_2, window_bounds = array<i64: 1, 128>}, {transform_indices = @transform_3, window_bounds = array<i64: 128, 128>}]} {
    %c0 = arith.constant 0 : index
    %c0_0 = arith.constant 0 : index
    %0 = vector.load %arg2[%c0, %c0_0] : memref<128x256xbf16, #tpu.memory_space<vmem>>, vector<128x256xbf16>
    %c0_1 = arith.constant 0 : index
    %c0_2 = arith.constant 0 : index
    %1 = vector.load %arg3[%c0_1, %c0_2] : memref<256x128xbf16, #tpu.memory_space<vmem>>, vector<256x128xbf16>
    %cst = arith.constant dense<0.000000e+00> : vector<128x128xf32>
    %2 = tpu.matmul %0, %1, %cst {dimension_numbers = #tpu.dot_dimension_numbers<[1], [0], [0], [1], [0, 0, 1, 1], [], []>} : vector<128x256xbf16>, vector<256x128xbf16>, vector<128x128xf32> -> vector<128x128xf32>
    %c0_3 = arith.constant 0 : index
    %c0_4 = arith.constant 0 : index
    %3 = vector.load %arg4[%c0_3, %c0_4] : memref<1x128xf32, #tpu.memory_space<vmem>>, vector<1x128xf32>
    %4 = vector.broadcast %3 : vector<1x128xf32> to vector<128x128xf32>
    %5 = arith.addf %2, %4 : vector<128x128xf32>
    %cst_5 = arith.constant 0.000000e+00 : f32
    %6 = vector.broadcast %cst_5 : f32 to vector<128x128xf32>
    %7 = arith.maximumf %5, %6 : vector<128x128xf32>
    %8 = arith.truncf %7 : vector<128x128xf32> to vector<128x128xbf16>
    %c0_6 = arith.constant 0 : index
    %c0_7 = arith.constant 0 : index
    %9 = vector.load %arg5[%c0_6, %c0_7] : memref<128x128xbf16, #tpu.memory_space<vmem>>, vector<128x128xbf16>
    tpu.vector_store %arg5[%c0_6, %c0_7], %8 {strides = array<i32>} : memref<128x128xbf16, #tpu.memory_space<vmem>>, vector<128x128xbf16>,
    return
  }
  func.func @transform_0(%arg0: i32, %arg1: i32) -> (i32, i32) {
    %c0_i32 = arith.constant 0 : i32
    %c0_i32_0 = arith.constant 0 : i32
    return %arg0, %c0_i32 : i32, i32
  }
  func.func @transform_1(%arg0: i32, %arg1: i32) -> (i32, i32) {
    %c0_i32 = arith.constant 0 : i32
    %c0_i32_0 = arith.constant 0 : i32
    return %c0_i32, %arg1 : i32, i32
  }
  func.func @transform_2(%arg0: i32, %arg1: i32) -> (i32, i32) {
    %c0_i32 = arith.constant 0 : i32
    %c0_i32_0 = arith.constant 0 : i32
    return %c0_i32, %arg1 : i32, i32
  }
  func.func @transform_3(%arg0: i32, %arg1: i32) -> (i32, i32) {
    %c0_i32 = arith.constant 0 : i32
    return %arg0, %arg1 : i32, i32
  }
}

module attributes {stable_mosaic.version = 11 : i64} {
  func.func @_gemm_bias_act_single_k_kernel(%arg0: i32, %arg1: i32, %arg2: memref<32x512xbf16, #tpu.memory_space<vmem>>, %arg3: memref<512x128xbf16, #tpu.memory_space<vmem>>, %arg4: memref<1x128xf32, #tpu.memory_space<vmem>>, %arg5: memref<32x128xbf16, #tpu.memory_space<vmem>>) attributes {dimension_semantics = [#tpu.dimension_semantics<parallel>, #tpu.dimension_semantics<parallel>], iteration_bounds = array<i64: 1, 1>, scalar_prefetch = 0 : i64, scratch_operands = 0 : i64, tpu.core_type = #tpu.core_type<tc>, window_params = [{transform_indices = @transform_0, window_bounds = array<i64: 32, 512>}, {transform_indices = @transform_1, window_bounds = array<i64: 512, 128>}, {transform_indices = @transform_2, window_bounds = array<i64: 1, 128>}, {transform_indices = @transform_3, window_bounds = array<i64: 32, 128>}]} {
    %c0 = arith.constant 0 : index
    %c0_0 = arith.constant 0 : index
    %0 = vector.load %arg2[%c0, %c0_0] : memref<32x512xbf16, #tpu.memory_space<vmem>>, vector<32x512xbf16>
    %c0_1 = arith.constant 0 : index
    %c0_2 = arith.constant 0 : index
    %1 = vector.load %arg3[%c0_1, %c0_2] : memref<512x128xbf16, #tpu.memory_space<vmem>>, vector<512x128xbf16>
    %cst = arith.constant dense<0.000000e+00> : vector<32x128xf32>
    %2 = tpu.matmul %0, %1, %cst {dimension_numbers = #tpu.dot_dimension_numbers<[1], [0], [0], [1], [0, 0, 1, 1], [], []>} : vector<32x512xbf16>, vector<512x128xbf16>, vector<32x128xf32> -> vector<32x128xf32>
    %c0_3 = arith.constant 0 : index
    %c0_4 = arith.constant 0 : index
    %3 = vector.load %arg4[%c0_3, %c0_4] : memref<1x128xf32, #tpu.memory_space<vmem>>, vector<1x128xf32>
    %4 = vector.broadcast %3 : vector<1x128xf32> to vector<32x128xf32>
    %5 = arith.addf %2, %4 : vector<32x128xf32>
    %cst_5 = arith.constant 0.000000e+00 : f32
    %6 = vector.broadcast %cst_5 : f32 to vector<32x128xf32>
    %7 = arith.maximumf %5, %6 : vector<32x128xf32>
    %8 = arith.truncf %7 : vector<32x128xf32> to vector<32x128xbf16>
    %c0_6 = arith.constant 0 : index
    %c0_7 = arith.constant 0 : index
    %9 = vector.load %arg5[%c0_6, %c0_7] : memref<32x128xbf16, #tpu.memory_space<vmem>>, vector<32x128xbf16>
    tpu.vector_store %arg5[%c0_6, %c0_7], %8 {strides = array<i32>} : memref<32x128xbf16, #tpu.memory_space<vmem>>, vector<32x128xbf16>,
    return
  }
  func.func @transform_0(%arg0: i32, %arg1: i32) -> (i32, i32) {
    %c0_i32 = arith.constant 0 : i32
    %c0_i32_0 = arith.constant 0 : i32
    return %arg0, %c0_i32 : i32, i32
  }
  func.func @transform_1(%arg0: i32, %arg1: i32) -> (i32, i32) {
    %c0_i32 = arith.constant 0 : i32
    %c0_i32_0 = arith.constant 0 : i32
    return %c0_i32, %arg1 : i32, i32
  }
  func.func @transform_2(%arg0: i32, %arg1: i32) -> (i32, i32) {
    %c0_i32 = arith.constant 0 : i32
    %c0_i32_0 = arith.constant 0 : i32
    return %c0_i32, %arg1 : i32, i32
  }
  func.func @transform_3(%arg0: i32, %arg1: i32) -> (i32, i32) {
    %c0_i32 = arith.constant 0 : i32
    return %arg0, %arg1 : i32, i32
  }
}

module attributes {stable_mosaic.version = 11 : i64} {
  func.func @_gemm_bias_act_single_k_kernel(%arg0: i32, %arg1: i32, %arg2: memref<16x640xbf16, #tpu.memory_space<vmem>>, %arg3: memref<640x128xbf16, #tpu.memory_space<vmem>>, %arg4: memref<1x128xf32, #tpu.memory_space<vmem>>, %arg5: memref<16x128xbf16, #tpu.memory_space<vmem>>) attributes {dimension_semantics = [#tpu.dimension_semantics<parallel>, #tpu.dimension_semantics<parallel>], iteration_bounds = array<i64: 1, 1>, scalar_prefetch = 0 : i64, scratch_operands = 0 : i64, tpu.core_type = #tpu.core_type<tc>, window_params = [{transform_indices = @transform_0, window_bounds = array<i64: 16, 640>}, {transform_indices = @transform_1, window_bounds = array<i64: 640, 128>}, {transform_indices = @transform_2, window_bounds = array<i64: 1, 128>}, {transform_indices = @transform_3, window_bounds = array<i64: 16, 128>}]} {
    %c0 = arith.constant 0 : index
    %c0_0 = arith.constant 0 : index
    %0 = vector.load %arg2[%c0, %c0_0] : memref<16x640xbf16, #tpu.memory_space<vmem>>, vector<16x640xbf16>
    %c0_1 = arith.constant 0 : index
    %c0_2 = arith.constant 0 : index
    %1 = vector.load %arg3[%c0_1, %c0_2] : memref<640x128xbf16, #tpu.memory_space<vmem>>, vector<640x128xbf16>
    %cst = arith.constant dense<0.000000e+00> : vector<16x128xf32>
    %2 = tpu.matmul %0, %1, %cst {dimension_numbers = #tpu.dot_dimension_numbers<[1], [0], [0], [1], [0, 0, 1, 1], [], []>} : vector<16x640xbf16>, vector<640x128xbf16>, vector<16x128xf32> -> vector<16x128xf32>
    %c0_3 = arith.constant 0 : index
    %c0_4 = arith.constant 0 : index
    %3 = vector.load %arg4[%c0_3, %c0_4] : memref<1x128xf32, #tpu.memory_space<vmem>>, vector<1x128xf32>
    %4 = vector.broadcast %3 : vector<1x128xf32> to vector<16x128xf32>
    %5 = arith.addf %2, %4 : vector<16x128xf32>
    %cst_5 = arith.constant 0.000000e+00 : f32
    %6 = vector.broadcast %cst_5 : f32 to vector<16x128xf32>
    %7 = arith.maximumf %5, %6 : vector<16x128xf32>
    %8 = arith.truncf %7 : vector<16x128xf32> to vector<16x128xbf16>
    %c0_6 = arith.constant 0 : index
    %c0_7 = arith.constant 0 : index
    %9 = vector.load %arg5[%c0_6, %c0_7] : memref<16x128xbf16, #tpu.memory_space<vmem>>, vector<16x128xbf16>
    tpu.vector_store %arg5[%c0_6, %c0_7], %8 {strides = array<i32>} : memref<16x128xbf16, #tpu.memory_space<vmem>>, vector<16x128xbf16>,
    return
  }
  func.func @transform_0(%arg0: i32, %arg1: i32) -> (i32, i32) {
    %c0_i32 = arith.constant 0 : i32
    %c0_i32_0 = arith.constant 0 : i32
    return %arg0, %c0_i32 : i32, i32
  }
  func.func @transform_1(%arg0: i32, %arg1: i32) -> (i32, i32) {
    %c0_i32 = arith.constant 0 : i32
    %c0_i32_0 = arith.constant 0 : i32
    return %c0_i32, %arg1 : i32, i32
  }
  func.func @transform_2(%arg0: i32, %arg1: i32) -> (i32, i32) {
    %c0_i32 = arith.constant 0 : i32
    %c0_i32_0 = arith.constant 0 : i32
    return %c0_i32, %arg1 : i32, i32
  }
  func.func @transform_3(%arg0: i32, %arg1: i32) -> (i32, i32) {
    %c0_i32 = arith.constant 0 : i32
    return %arg0, %arg1 : i32, i32
  }
}

module attributes {stable_mosaic.version = 11 : i64} {
  func.func @_fc_head_fused_kernel(%arg0: i32, %arg1: i32, %arg2: memref<16x128xbf16, #tpu.memory_space<vmem>>, %arg3: memref<128x512xbf16, #tpu.memory_space<vmem>>, %arg4: memref<1x512xf32, #tpu.memory_space<vmem>>, %arg5: memref<512x128xbf16, #tpu.memory_space<vmem>>, %arg6: memref<1x128xf32, #tpu.memory_space<vmem>>, %arg7: memref<16x128xf32, #tpu.memory_space<vmem>>, %arg8: memref<16x512xf32, #tpu.memory_space<vmem>>) attributes {dimension_semantics = [#tpu.dimension_semantics<parallel>, #tpu.dimension_semantics<arbitrary>], iteration_bounds = array<i64: 1, 1>, scalar_prefetch = 0 : i64, scratch_operands = 1 : i64, tpu.core_type = #tpu.core_type<tc>, window_params = [{transform_indices = @transform_0, window_bounds = array<i64: 16, 128>}, {transform_indices = @transform_1, window_bounds = array<i64: 128, 512>}, {pipeline_mode = #tpu.pipeline_mode<synchronous>, transform_indices = @transform_2, window_bounds = array<i64: 1, 512>}, {pipeline_mode = #tpu.pipeline_mode<synchronous>, transform_indices = @transform_3, window_bounds = array<i64: 512, 128>}, {pipeline_mode = #tpu.pipeline_mode<synchronous>, transform_indices = @transform_4, window_bounds = array<i64: 1, 128>}, {transform_indices = @transform_5, window_bounds = array<i64: 16, 128>}]} {
    %c0_i32 = arith.constant 0 : i32
    %0 = arith.cmpi eq, %arg1, %c0_i32 : i32
    %1 = arith.extui %0 : i1 to i32
    %c0_i32_0 = arith.constant 0 : i32
    %2 = arith.cmpi ne, %1, %c0_i32_0 : i32
    scf.if %2 {
      %c0_10 = arith.constant 0 : index
      %c0_11 = arith.constant 0 : index
      %12 = vector.load %arg4[%c0_10, %c0_11] : memref<1x512xf32, #tpu.memory_space<vmem>>, vector<1x512xf32>
      %13 = vector.shape_cast %12 : vector<1x512xf32> to vector<1x512xf32>
      %14 = vector.broadcast %13 : vector<1x512xf32> to vector<16x512xf32>
      %c0_12 = arith.constant 0 : index
      %c0_13 = arith.constant 0 : index
      %15 = vector.load %arg8[%c0_12, %c0_13] : memref<16x512xf32, #tpu.memory_space<vmem>>, vector<16x512xf32>
      tpu.vector_store %arg8[%c0_12, %c0_13], %14 {strides = array<i32>} : memref<16x512xf32, #tpu.memory_space<vmem>>, vector<16x512xf32>,
    } else {
    }
    %c0 = arith.constant 0 : index
    %c0_1 = arith.constant 0 : index
    %3 = vector.load %arg8[%c0, %c0_1] : memref<16x512xf32, #tpu.memory_space<vmem>>, vector<16x512xf32>
    %c0_2 = arith.constant 0 : index
    %c0_3 = arith.constant 0 : index
    %4 = vector.load %arg2[%c0_2, %c0_3] : memref<16x128xbf16, #tpu.memory_space<vmem>>, vector<16x128xbf16>
    %c0_4 = arith.constant 0 : index
    %c0_5 = arith.constant 0 : index
    %5 = vector.load %arg3[%c0_4, %c0_5] : memref<128x512xbf16, #tpu.memory_space<vmem>>, vector<128x512xbf16>
    %cst = arith.constant dense<0.000000e+00> : vector<16x512xf32>
    %6 = tpu.matmul %4, %5, %cst {dimension_numbers = #tpu.dot_dimension_numbers<[1], [0], [0], [1], [0, 0, 1, 1], [], []>} : vector<16x128xbf16>, vector<128x512xbf16>, vector<16x512xf32> -> vector<16x512xf32>
    %7 = arith.addf %3, %6 : vector<16x512xf32>
    %c0_6 = arith.constant 0 : index
    %c0_7 = arith.constant 0 : index
    %8 = vector.load %arg8[%c0_6, %c0_7] : memref<16x512xf32, #tpu.memory_space<vmem>>, vector<16x512xf32>
    tpu.vector_store %arg8[%c0_6, %c0_7], %7 {strides = array<i32>} : memref<16x512xf32, #tpu.memory_space<vmem>>, vector<16x512xf32>,
    %c0_i32_8 = arith.constant 0 : i32
    %9 = arith.cmpi eq, %arg1, %c0_i32_8 : i32
    %10 = arith.extui %9 : i1 to i32
    %c0_i32_9 = arith.constant 0 : i32
    %11 = arith.cmpi ne, %10, %c0_i32_9 : i32
    scf.if %11 {
      %c0_10 = arith.constant 0 : index
      %c0_11 = arith.constant 0 : index
      %12 = vector.load %arg8[%c0_10, %c0_11] : memref<16x512xf32, #tpu.memory_space<vmem>>, vector<16x512xf32>
      %cst_12 = arith.constant 0.000000e+00 : f32
      %13 = vector.broadcast %cst_12 : f32 to vector<16x512xf32>
      %14 = arith.maximumf %12, %13 : vector<16x512xf32>
      %15 = arith.truncf %14 : vector<16x512xf32> to vector<16x512xbf16>
      %c0_13 = arith.constant 0 : index
      %c0_14 = arith.constant 0 : index
      %16 = vector.load %arg5[%c0_13, %c0_14] : memref<512x128xbf16, #tpu.memory_space<vmem>>, vector<512x128xbf16>
      %cst_15 = arith.constant dense<0.000000e+00> : vector<16x128xf32>
      %17 = tpu.matmul %15, %16, %cst_15 {dimension_numbers = #tpu.dot_dimension_numbers<[1], [0], [0], [1], [0, 0, 1, 1], [], []>} : vector<16x512xbf16>, vector<512x128xbf16>, vector<16x128xf32> -> vector<16x128xf32>
      %c0_16 = arith.constant 0 : index
      %c0_17 = arith.constant 0 : index
      %18 = vector.load %arg6[%c0_16, %c0_17] : memref<1x128xf32, #tpu.memory_space<vmem>>, vector<1x128xf32>
      %19 = vector.broadcast %18 : vector<1x128xf32> to vector<16x128xf32>
      %20 = arith.addf %17, %19 : vector<16x128xf32>
      %c0_18 = arith.constant 0 : index
      %c0_19 = arith.constant 0 : index
      %21 = vector.load %arg7[%c0_18, %c0_19] : memref<16x128xf32, #tpu.memory_space<vmem>>, vector<16x128xf32>
      tpu.vector_store %arg7[%c0_18, %c0_19], %20 {strides = array<i32>} : memref<16x128xf32, #tpu.memory_space<vmem>>, vector<16x128xf32>,
    } else {
    }
    return
  }
  func.func @transform_0(%arg0: i32, %arg1: i32) -> (i32, i32) {
    %c0_i32 = arith.constant 0 : i32
    return %arg0, %arg1 : i32, i32
  }
  func.func @transform_1(%arg0: i32, %arg1: i32) -> (i32, i32) {
    %c0_i32 = arith.constant 0 : i32
    %c0_i32_0 = arith.constant 0 : i32
    return %arg1, %c0_i32 : i32, i32
  }
  func.func @transform_2(%arg0: i32, %arg1: i32) -> (i32, i32) {
    %c0_i32 = arith.constant 0 : i32
    %c0_i32_0 = arith.constant 0 : i32
    %c0_i32_1 = arith.constant 0 : i32
    return %c0_i32, %c0_i32_0 : i32, i32
  }
  func.func @transform_3(%arg0: i32, %arg1: i32) -> (i32, i32) {
    %c0_i32 = arith.constant 0 : i32
    %c0_i32_0 = arith.constant 0 : i32
    %c0_i32_1 = arith.constant 0 : i32
    return %c0_i32, %c0_i32_0 : i32, i32
  }
  func.func @transform_4(%arg0: i32, %arg1: i32) -> (i32, i32) {
    %c0_i32 = arith.constant 0 : i32
    %c0_i32_0 = arith.constant 0 : i32
    %c0_i32_1 = arith.constant 0 : i32
    return %c0_i32, %c0_i32_0 : i32, i32
  }
  func.func @transform_5(%arg0: i32, %arg1: i32) -> (i32, i32) {
    %c0_i32 = arith.constant 0 : i32
    %c0_i32_0 = arith.constant 0 : i32
    return %arg0, %c0_i32 : i32, i32
  }
}

</mosaic_0001>

<bundles_post_ra>
// kernel: dqn_forward.4
= control target key start
LH: loop header
LB: loop body
LE: loop exit
PB: predicated region body
PF: predicated region fallthrough
CT: control target
= control target key end

     0   :  { %s836_s1 = inlined_call_operand.vmem [shape: bf16[256,128], index: 1, kind: input, shape index: {}]   ;;  %s837_s0 = inlined_call_operand.vmem [shape: bf16[128,256], index: 0, kind: input, shape index: {}]   ;;  %s838_s2 = inlined_call_operand.vmem [shape: f32[1,128], index: 2, kind: input, shape index: {}]   ;;  %s839_s3 = inlined_call_operand.vmem [shape: bf16[128,128], index: 3, kind: output, shape index: {}]  }
   0x1   :  { %v635_v0 = vld [vmem:[%s836_s1 + $0x40] sm:$0xff]   ;;  %v637_v2 = vld [vmem:[%s836_s1 + $0x48] sm:$0xff]   ;;  %v639_v4 = vld [vmem:[%s836_s1 + $0x50] sm:$0xff]  }
   0x2   :  { %v636_v1 = vld [vmem:[%s836_s1] sm:$0xff]   ;;  %555 = vmatprep.subr.bf16.mxu0 %v635_v0  ;;  %619 = vmatprep.subr.bf16.mxu1 %v635_v0  ;;  %v638_v3 = vld [vmem:[%s836_s1 + $0x8] sm:$0xff]   ;;  %v640_v5 = vld [vmem:[%s836_s1 + $0x10] sm:$0xff]  }
   0x3   :  { %556 = vmatpush3.bf16.msra.mxu0 %v636_v1  ;;  %627 = vmatpush3.bf16.msra.mxu1 %v636_v1  ;;  %v641_v6 = vld [vmem:[%s836_s1 + $0x58] sm:$0xff]   ;;  %v643_v8 = vld [vmem:[%s836_s1 + $0x60] sm:$0xff]   ;;  %v645_v10 = vld [vmem:[%s836_s1 + $0x68] sm:$0xff]  }
   0x4   :  { %557 = vmatprep.subr.bf16.mxu0 %v637_v2  ;;  %620 = vmatprep.subr.bf16.mxu1 %v637_v2  ;;  %v642_v7 = vld [vmem:[%s836_s1 + $0x18] sm:$0xff]   ;;  %v644_v9 = vld [vmem:[%s836_s1 + $0x20] sm:$0xff]   ;;  %v646_v13 = vld [vmem:[%s836_s1 + $0x28] sm:$0xff]  }
   0x5   :  { %v653_v11 = vld [vmem:[%s837_s0 + $0x4] ss:$8 sps:$4 sm:$0xff]   ;;  %v647_v14 = vld [vmem:[%s836_s1 + $0x70] sm:$0xff]   ;;  %v649_v16 = vld [vmem:[%s836_s1 + $0x78] sm:$0xff]  }
   0x6   :  { %v656_v12 = vld [vmem:[%s837_s0 + $0x44] ss:$8 sps:$4 sm:$0xff]   ;;  %278 = vmatprep.mubr.bf16.mxu0 %v653_v11  ;;  %v648_v15 = vld [vmem:[%s836_s1 + $0x30] sm:$0xff]   ;;  %v650_v17 = vld [vmem:[%s836_s1 + $0x38] sm:$0xff]  }
   0x7   :  { %558 = vmatpush3.bf16.msra.mxu0 %v638_v3  ;;  %628 = vmatpush3.bf16.msra.mxu1 %v638_v3  ;;  %v651_v18 = vld [vmem:[%s837_s0] ss:$8 sps:$4 sm:$0xff]   ;;  %v657_v20 = vld [vmem:[%s837_s0 + $0x14] ss:$8 sps:$4 sm:$0xff]   ;;  %v661_v22 = vld [vmem:[%s837_s0 + $0x10] ss:$8 sps:$4 sm:$0xff]  }
   0x8   :  { %559 = vmatprep.subr.bf16.mxu0 %v639_v4  ;;  %621 = vmatprep.subr.bf16.mxu1 %v639_v4  ;;  %v654_v19 = vld [vmem:[%s837_s0 + $0x40] ss:$8 sps:$4 sm:$0xff]   ;;  %v659_v21 = vld [vmem:[%s837_s0 + $0x54] ss:$8 sps:$4 sm:$0xff]   ;;  %v662_v23 = vld [vmem:[%s837_s0 + $0x50] ss:$8 sps:$4 sm:$0xff]  }
   0x9   :  { %310 = vmatprep.mubr.bf16.mxu1 %v656_v12  ;;  %v663_v24 = vld [vmem:[%s837_s0 + $0x24] ss:$8 sps:$4 sm:$0xff]   ;;  %v667_v26 = vld [vmem:[%s837_s0 + $0x20] ss:$8 sps:$4 sm:$0xff]   ;;  %v669_v28 = vld [vmem:[%s837_s0 + $0x34] ss:$8 sps:$4 sm:$0xff]  }
   0xa   :  { %v665_v25 = vld [vmem:[%s837_s0 + $0x64] ss:$8 sps:$4 sm:$0xff]   ;;  %v668_v27 = vld [vmem:[%s837_s0 + $0x60] ss:$8 sps:$4 sm:$0xff]   ;;  %v671_v29 = vld [vmem:[%s837_s0 + $0x74] ss:$8 sps:$4 sm:$0xff]  }
   0xb   :  { %560 = vmatpush3.bf16.msra.mxu0 %v640_v5  ;;  %629 = vmatpush3.bf16.msra.mxu1 %v640_v5  ;;  %v673_v30 = vld [vmem:[%s837_s0 + $0x30] ss:$8 sps:$4 sm:$0xff]   ;;  %v794_v34 = vld [vmem:[%s838_s2] ss:$0 sm:$0xff] }
   0xc   :  { %561 = vmatprep.subr.bf16.mxu0 %v641_v6  ;;  %622 = vmatprep.subr.bf16.mxu1 %v641_v6  ;;  %v674_v31 = vld [vmem:[%s837_s0 + $0x70] ss:$8 sps:$4 sm:$0xff]  }
   0xf   :  { %562 = vmatpush3.bf16.msra.mxu0 %v642_v7  ;;  %630 = vmatpush3.bf16.msra.mxu1 %v642_v7 }
  0x10   :  { %563 = vmatprep.subr.bf16.mxu0 %v643_v8  ;;  %623 = vmatprep.subr.bf16.mxu1 %v643_v8 }
  0x13   :  { %564 = vmatpush3.bf16.msra.mxu0 %v644_v9  ;;  %631 = vmatpush3.bf16.msra.mxu1 %v644_v9 }
  0x14   :  { %565 = vmatprep.subr.bf16.mxu0 %v645_v10  ;;  %624 = vmatprep.subr.bf16.mxu1 %v645_v10 }
  0x17   :  { %566 = vmatpush3.bf16.msra.mxu0 %v646_v13  ;;  %632 = vmatpush3.bf16.msra.mxu1 %v646_v13 }
  0x18   :  { %567 = vmatprep.subr.bf16.mxu0 %v647_v14  ;;  %625 = vmatprep.subr.bf16.mxu1 %v647_v14 }
  0x1b   :  { %568 = vmatpush3.bf16.msra.mxu0 %v648_v15  ;;  %633 = vmatpush3.bf16.msra.mxu1 %v648_v15 }
  0x1c   :  { %569 = vmatprep.subr.bf16.mxu0 %v649_v16  ;;  %626 = vmatprep.subr.bf16.mxu1 %v649_v16 }
  0x1f   :  { %570 = vmatpush3.bf16.msra.mxu0 %v650_v17  ;;  %634 = vmatpush3.bf16.msra.mxu1 %v650_v17 }
  0x22   :  { %279 = vmatmul.mubr.bf16.vlgmr.msra.gmra.mrb[0].mxu0 %v651_v18  ;;  %311 = vmatmul.mubr.bf16.vlgmr.msra.gmra.mrb[0].mxu1 %v654_v19 }
  0x23   :  { %286 = vmatprep.mubr.bf16.mxu0 %v657_v20  ;;  %318 = vmatprep.mubr.bf16.mxu1 %v659_v21 }
  0x2a   :  { %287 = vmatmul.mubr.bf16.gmra.mrb[4].mxu0 %v661_v22  ;;  %319 = vmatmul.mubr.bf16.gmra.mrb[4].mxu1 %v662_v23 }
  0x2b   :  { %294 = vmatprep.mubr.bf16.mxu0 %v663_v24  ;;  %326 = vmatprep.mubr.bf16.mxu1 %v665_v25 }
  0x32   :  { %295 = vmatmul.mubr.bf16.gmra.mrb[8].mxu0 %v667_v26  ;;  %327 = vmatmul.mubr.bf16.gmra.mrb[8].mxu1 %v668_v27 }
  0x33   :  { %302 = vmatprep.mubr.bf16.mxu0 %v669_v28  ;;  %334 = vmatprep.mubr.bf16.mxu1 %v671_v29 }
  0x3a   :  { %303 = vmatmul.mubr.bf16.gmra.mrb[12].mxu0 %v673_v30  ;;  %335 = vmatmul.mubr.bf16.gmra.mrb[12].mxu1 %v674_v31 }
  0xf5   :  { %v571_v32 = vpop.f32.mrb[0].mxu0  ;;  %v595_v33 = vpop.f32.mrb[0].mxu1 }
  0xf6   :  { %v572_v35 = vpop.f32.mrb[1].mxu0  ;;  %v596_v36 = vpop.f32.mrb[1].mxu1 }
  0xf7   :  { %v573_v37 = vadd.f32 %v572_v35, %v571_v32  ;;  %v597_v38 = vadd.f32 %v596_v36, %v595_v33  ;;  %v574_v39 = vpop.f32.mrb[2].mxu0  ;;  %v598_v40 = vpop.f32.mrb[2].mxu1 }
  0xf8   :  { %v575_v41 = vpop.f32.mrb[3].mxu0  ;;  %v599_v42 = vpop.f32.mrb[3].mxu1 }
  0xf9   :  { %v281_v43 = vadd.f32 %v573_v37, %v794_v34  ;;  %v313_v44 = vadd.f32 %v597_v38, %v794_v34  ;;  %v576_v45 = vadd.f32 %v575_v41, %v574_v39  ;;  %v600_v46 = vadd.f32 %v599_v42, %v598_v40 }
  0xfb   :  { %v284_v47 = vadd.f32 %v576_v45, %v794_v34  ;;  %v316_v48 = vadd.f32 %v600_v46, %v794_v34  ;;  %v343_v49 = vmax.f32 %v281_v43, 0.0  ;;  %v351_v50 = vmax.f32 %v313_v44, 0.0 }
  0xfd   :  { %v344_v51 = vmax.f32 %v284_v47, 0.0  ;;  %v352_v52 = vmax.f32 %v316_v48, 0.0  ;;  %v577_v53 = vpop.f32.mrb[4].mxu0  ;;  %v601_v54 = vpop.f32.mrb[4].mxu1 }
  0xfe   :  { %v578_v55 = vpop.f32.mrb[5].mxu0  ;;  %v602_v56 = vpop.f32.mrb[5].mxu1 }
  0xff   :  { %v511_v57 = vpack.c.bf16 %v344_v51, %v343_v49  ;;  %v531_v58 = vpack.c.bf16 %v352_v52, %v351_v50  ;;  %v579_v59 = vadd.f32 %v578_v55, %v577_v53  ;;  %v603_v60 = vadd.f32 %v602_v56, %v601_v54  ;;  %v580_v61 = vpop.f32.mrb[6].mxu0  ;;  %v604_v62 = vpop.f32.mrb[6].mxu1 }
 0x100   :  { %v581_v63 = vpop.f32.mrb[7].mxu0  ;;  %v605_v0 = vpop.f32.mrb[7].mxu1 }
 0x101   :  { %512 = vst [vmem:[%s839_s3] sm:$0xff] %v511_v57   ;;  %551 = vst [vmem:[%s839_s3 + $0x20] sm:$0xff] %v531_v58   ;;  %v289_v1 = vadd.f32 %v579_v59, %v794_v34  ;;  %v321_v2 = vadd.f32 %v603_v60, %v794_v34  ;;  %v582_v3 = vadd.f32 %v581_v63, %v580_v61 }
 0x102   :  { %v606_v4 = vadd.f32 %v605_v0, %v604_v62 }
 0x103   :  { %v292_v5 = vadd.f32 %v582_v3, %v794_v34  ;;  %v345_v7 = vmax.f32 %v289_v1, 0.0  ;;  %v353_v8 = vmax.f32 %v321_v2, 0.0 }
 0x104   :  { %v324_v6 = vadd.f32 %v606_v4, %v794_v34 }
 0x105   :  { %v346_v9 = vmax.f32 %v292_v5, 0.0  ;;  %v583_v11 = vpop.f32.mrb[8].mxu0  ;;  %v607_v12 = vpop.f32.mrb[8].mxu1 }
 0x106   :  { %v354_v10 = vmax.f32 %v324_v6, 0.0  ;;  %v584_v13 = vpop.f32.mrb[9].mxu0  ;;  %v608_v14 = vpop.f32.mrb[9].mxu1 }
 0x107   :  { %v516_v15 = vpack.c.bf16 %v346_v9, %v345_v7  ;;  %v585_v17 = vadd.f32 %v584_v13, %v583_v11  ;;  %v609_v18 = vadd.f32 %v608_v14, %v607_v12  ;;  %v586_v19 = vpop.f32.mrb[10].mxu0  ;;  %v610_v20 = vpop.f32.mrb[10].mxu1 }
 0x108   :  { %v536_v16 = vpack.c.bf16 %v354_v10, %v353_v8  ;;  %v587_v21 = vpop.f32.mrb[11].mxu0  ;;  %v611_v22 = vpop.f32.mrb[11].mxu1 }
 0x109   :  { %548 = vst [vmem:[%s839_s3 + $0x8] sm:$0xff] %v516_v15   ;;  %v297_v23 = vadd.f32 %v585_v17, %v794_v34  ;;  %v329_v24 = vadd.f32 %v609_v18, %v794_v34  ;;  %v588_v25 = vadd.f32 %v587_v21, %v586_v19  ;;  %v612_v26 = vadd.f32 %v611_v22, %v610_v20 }
 0x10a   :  { %552 = vst [vmem:[%s839_s3 + $0x28] sm:$0xff] %v536_v16  }
 0x10b   :  { %v300_v27 = vadd.f32 %v588_v25, %v794_v34  ;;  %v332_v28 = vadd.f32 %v612_v26, %v794_v34  ;;  %v347_v29 = vmax.f32 %v297_v23, 0.0  ;;  %v355_v30 = vmax.f32 %v329_v24, 0.0 }
 0x10d   :  { %v348_v31 = vmax.f32 %v300_v27, 0.0  ;;  %v356_v32 = vmax.f32 %v332_v28, 0.0  ;;  %v589_v33 = vpop.f32.mrb[12].mxu0  ;;  %v613_v35 = vpop.f32.mrb[12].mxu1 }
 0x10e   :  { %v590_v36 = vpop.f32.mrb[13].mxu0  ;;  %v614_v37 = vpop.f32.mrb[13].mxu1 }
 0x10f   :  { %v521_v38 = vpack.c.bf16 %v348_v31, %v347_v29  ;;  %v541_v39 = vpack.c.bf16 %v356_v32, %v355_v30  ;;  %v591_v40 = vadd.f32 %v590_v36, %v589_v33  ;;  %v615_v41 = vadd.f32 %v614_v37, %v613_v35  ;;  %v592_v42 = vpop.f32.mrb[14].mxu0  ;;  %v616_v43 = vpop.f32.mrb[14].mxu1 }
 0x110   :  { %v593_v44 = vpop.f32.mrb[15].mxu0  ;;  %v617_v45 = vpop.f32.mrb[15].mxu1 }
 0x111   :  { %549 = vst [vmem:[%s839_s3 + $0x10] sm:$0xff] %v521_v38   ;;  %553 = vst [vmem:[%s839_s3 + $0x30] sm:$0xff] %v541_v39   ;;  %v305_v46 = vadd.f32 %v591_v40, %v794_v34  ;;  %v337_v47 = vadd.f32 %v615_v41, %v794_v34  ;;  %v594_v48 = vadd.f32 %v593_v44, %v592_v42 }
 0x112   :  { %v618_v49 = vadd.f32 %v617_v45, %v616_v43 }
 0x113   :  { %v308_v50 = vadd.f32 %v594_v48, %v794_v34  ;;  %v349_v52 = vmax.f32 %v305_v46, 0.0  ;;  %v357_v53 = vmax.f32 %v337_v47, 0.0 }
 0x114   :  { %v340_v51 = vadd.f32 %v618_v49, %v794_v34 }
 0x115   :  { %v350_v54 = vmax.f32 %v308_v50, 0.0 }
 0x116   :  { %v358_v55 = vmax.f32 %v340_v51, 0.0 }
 0x117   :  { %v526_v56 = vpack.c.bf16 %v350_v54, %v349_v52 }
 0x118   :  { %v546_v57 = vpack.c.bf16 %v358_v55, %v357_v53 }
 0x119   :  { %550 = vst [vmem:[%s839_s3 + $0x18] sm:$0xff] %v526_v56  }
 0x11a   :  { %554 = vst [vmem:[%s839_s3 + $0x38] sm:$0xff] %v546_v57  }

// kernel: dqn_forward.5
= control target key start
LH: loop header
LB: loop body
LE: loop exit
PB: predicated region body
PF: predicated region fallthrough
CT: control target
= control target key end

     0   :  { %s761_s1 = inlined_call_operand.vmem [shape: bf16[512,128], index: 1, kind: input, shape index: {}]   ;;  %s762_s0 = inlined_call_operand.vmem [shape: bf16[32,512], index: 0, kind: input, shape index: {}]   ;;  %s763_s2 = inlined_call_operand.vmem [shape: f32[1,128], index: 2, kind: input, shape index: {}]   ;;  %s764_s3 = inlined_call_operand.vmem [shape: bf16[32,128], index: 3, kind: output, shape index: {}]  }
   0x1   :  { %v568_v0 = vld [vmem:[%s761_s1 + $0x40] sm:$0xff]   ;;  %v572_v4 = vld [vmem:[%s761_s1 + $0x48] sm:$0xff]   ;;  %v576_v8 = vld [vmem:[%s761_s1 + $0x50] sm:$0xff]  }
   0x2   :  { %v569_v1 = vld [vmem:[%s761_s1 + $0xc0] sm:$0xff]   ;;  %512 = vmatprep.subr.bf16.mxu0 %v568_v0  ;;  %v573_v5 = vld [vmem:[%s761_s1 + $0xc8] sm:$0xff]   ;;  %v577_v9 = vld [vmem:[%s761_s1 + $0xd0] sm:$0xff]  }
   0x3   :  { %v570_v2 = vld [vmem:[%s761_s1] sm:$0xff]   ;;  %540 = vmatprep.subr.bf16.mxu1 %v569_v1  ;;  %v574_v6 = vld [vmem:[%s761_s1 + $0x8] sm:$0xff]   ;;  %v578_v10 = vld [vmem:[%s761_s1 + $0x10] sm:$0xff]  }
   0x4   :  { %v571_v3 = vld [vmem:[%s761_s1 + $0x80] sm:$0xff]   ;;  %513 = vmatpush3.bf16.msra.mxu0 %v570_v2  ;;  %v575_v7 = vld [vmem:[%s761_s1 + $0x88] sm:$0xff]   ;;  %v579_v11 = vld [vmem:[%s761_s1 + $0x90] sm:$0xff]  }
   0x5   :  { %541 = vmatpush3.bf16.msra.mxu1 %v571_v3  ;;  %514 = vmatprep.subr.bf16.mxu0 %v572_v4  ;;  %v580_v12 = vld [vmem:[%s761_s1 + $0x58] sm:$0xff]   ;;  %v584_v16 = vld [vmem:[%s761_s1 + $0x60] sm:$0xff]   ;;  %v588_v20 = vld [vmem:[%s761_s1 + $0x68] sm:$0xff]  }
   0x6   :  { %542 = vmatprep.subr.bf16.mxu1 %v573_v5  ;;  %v581_v13 = vld [vmem:[%s761_s1 + $0xd8] sm:$0xff]   ;;  %v585_v17 = vld [vmem:[%s761_s1 + $0xe0] sm:$0xff]   ;;  %v589_v21 = vld [vmem:[%s761_s1 + $0xe8] sm:$0xff]  }
   0x7   :  { %v582_v14 = vld [vmem:[%s761_s1 + $0x18] sm:$0xff]   ;;  %v586_v18 = vld [vmem:[%s761_s1 + $0x20] sm:$0xff]   ;;  %v590_v22 = vld [vmem:[%s761_s1 + $0x28] sm:$0xff]  }
   0x8   :  { %515 = vmatpush3.bf16.msra.mxu0 %v574_v6  ;;  %v583_v15 = vld [vmem:[%s761_s1 + $0x98] sm:$0xff]   ;;  %v587_v19 = vld [vmem:[%s761_s1 + $0xa0] sm:$0xff]   ;;  %v591_v23 = vld [vmem:[%s761_s1 + $0xa8] sm:$0xff]  }
   0x9   :  { %543 = vmatpush3.bf16.msra.mxu1 %v575_v7  ;;  %516 = vmatprep.subr.bf16.mxu0 %v576_v8  ;;  %v592_v24 = vld [vmem:[%s761_s1 + $0x70] sm:$0xff]   ;;  %v596_v28 = vld [vmem:[%s761_s1 + $0x78] sm:$0xff]   ;;  %v452_v42 = vld [vmem:[%s763_s2] ss:$0 sm:$0xff] }
   0xa   :  { %544 = vmatprep.subr.bf16.mxu1 %v577_v9  ;;  %v593_v25 = vld [vmem:[%s761_s1 + $0xf0] sm:$0xff]   ;;  %v597_v29 = vld [vmem:[%s761_s1 + $0xf8] sm:$0xff]  }
   0xb   :  { %v594_v26 = vld [vmem:[%s761_s1 + $0x30] sm:$0xff]   ;;  %v598_v30 = vld [vmem:[%s761_s1 + $0x38] sm:$0xff]  }
   0xc   :  { %517 = vmatpush3.bf16.msra.mxu0 %v578_v10  ;;  %v595_v27 = vld [vmem:[%s761_s1 + $0xb0] sm:$0xff]   ;;  %v599_v31 = vld [vmem:[%s761_s1 + $0xb8] sm:$0xff]  }
   0xd   :  { %545 = vmatpush3.bf16.msra.mxu1 %v579_v11  ;;  %518 = vmatprep.subr.bf16.mxu0 %v580_v12  ;;  %v600_v32 = vld [vmem:[%s762_s0] ss:$16 sps:$4 sm:$0xff]   ;;  %v602_v33 = vld [vmem:[%s762_s0 + $0x4] ss:$16 sps:$4 sm:$0xff]   ;;  %v603_v34 = vld [vmem:[%s762_s0 + $0x8] ss:$16 sps:$4 sm:$0xff]  }
   0xe   :  { %546 = vmatprep.subr.bf16.mxu1 %v581_v13  ;;  %v605_v35 = vld [vmem:[%s762_s0 + $0xc] ss:$16 sps:$4 sm:$0xff]   ;;  %358 = vmatprep.mubr.bf16.mxu0 %v602_v33  ;;  %v606_v36 = vld [vmem:[%s762_s0 + $0x24] ss:$16 sps:$4 sm:$0xff]   ;;  %v610_v38 = vld [vmem:[%s762_s0 + $0x20] ss:$16 sps:$4 sm:$0xff]  }
   0xf   :  { %407 = vmatprep.mubr.bf16.mxu1 %v605_v35  ;;  %v608_v37 = vld [vmem:[%s762_s0 + $0x2c] ss:$16 sps:$4 sm:$0xff]   ;;  %v611_v39 = vld [vmem:[%s762_s0 + $0x28] ss:$16 sps:$4 sm:$0xff]  }
  0x10   :  { %519 = vmatpush3.bf16.msra.mxu0 %v582_v14 }
  0x11   :  { %547 = vmatpush3.bf16.msra.mxu1 %v583_v15  ;;  %520 = vmatprep.subr.bf16.mxu0 %v584_v16 }
  0x12   :  { %548 = vmatprep.subr.bf16.mxu1 %v585_v17 }
  0x14   :  { %521 = vmatpush3.bf16.msra.mxu0 %v586_v18 }
  0x15   :  { %549 = vmatpush3.bf16.msra.mxu1 %v587_v19  ;;  %522 = vmatprep.subr.bf16.mxu0 %v588_v20 }
  0x16   :  { %550 = vmatprep.subr.bf16.mxu1 %v589_v21 }
  0x18   :  { %523 = vmatpush3.bf16.msra.mxu0 %v590_v22 }
  0x19   :  { %551 = vmatpush3.bf16.msra.mxu1 %v591_v23  ;;  %524 = vmatprep.subr.bf16.mxu0 %v592_v24 }
  0x1a   :  { %552 = vmatprep.subr.bf16.mxu1 %v593_v25 }
  0x1c   :  { %525 = vmatpush3.bf16.msra.mxu0 %v594_v26 }
  0x1d   :  { %553 = vmatpush3.bf16.msra.mxu1 %v595_v27  ;;  %526 = vmatprep.subr.bf16.mxu0 %v596_v28 }
  0x1e   :  { %554 = vmatprep.subr.bf16.mxu1 %v597_v29 }
  0x20   :  { %527 = vmatpush3.bf16.msra.mxu0 %v598_v30 }
  0x21   :  { %555 = vmatpush3.bf16.msra.mxu1 %v599_v31 }
  0x23   :  { %359 = vmatmul.mubr.bf16.vlgmr.msra.gmra.mrb[0].mxu0 %v600_v32 }
  0x24   :  { %408 = vmatmul.mubr.bf16.vlgmr.msra.gmra.mrb[0].mxu1 %v603_v34  ;;  %366 = vmatprep.mubr.bf16.mxu0 %v606_v36 }
  0x25   :  { %415 = vmatprep.mubr.bf16.mxu1 %v608_v37 }
  0x2b   :  { %367 = vmatmul.mubr.bf16.gmra.mrb[4].mxu0 %v610_v38 }
  0x2c   :  { %416 = vmatmul.mubr.bf16.gmra.mrb[4].mxu1 %v611_v39 }
  0xf6   :  { %v528_v40 = vpop.f32.mrb[0].mxu0 }
  0xf7   :  { %v556_v41 = vpop.f32.mrb[0].mxu1  ;;  %v529_v43 = vpop.f32.mrb[1].mxu0 }
  0xf8   :  { %v530_v44 = vadd.f32 %v529_v43, %v528_v40  ;;  %v557_v45 = vpop.f32.mrb[1].mxu1  ;;  %v531_v46 = vpop.f32.mrb[2].mxu0 }
  0xf9   :  { %v558_v47 = vadd.f32 %v557_v45, %v556_v41  ;;  %v559_v48 = vpop.f32.mrb[2].mxu1  ;;  %v532_v49 = vpop.f32.mrb[3].mxu0 }
  0xfa   :  { %v361_v50 = vadd.f32 %v530_v44, %v452_v42  ;;  %v533_v51 = vadd.f32 %v532_v49, %v531_v46  ;;  %v560_v52 = vpop.f32.mrb[3].mxu1 }
  0xfb   :  { %v561_v53 = vadd.f32 %v560_v52, %v559_v48 }
  0xfc   :  { %v410_v54 = vadd.f32 %v558_v47, %v361_v50  ;;  %v364_v55 = vadd.f32 %v533_v51, %v452_v42 }
  0xfe   :  { %v413_v56 = vadd.f32 %v561_v53, %v364_v55  ;;  %v534_v57 = vpop.f32.mrb[4].mxu0  ;;  %v424_v60 = vmax.f32 %v410_v54, 0.0 }
  0xff   :  { %v562_v58 = vpop.f32.mrb[4].mxu1  ;;  %v535_v59 = vpop.f32.mrb[5].mxu0 }
 0x100   :  { %v425_v61 = vmax.f32 %v413_v56, 0.0  ;;  %v536_v62 = vadd.f32 %v535_v59, %v534_v57  ;;  %v563_v63 = vpop.f32.mrb[5].mxu1  ;;  %v537_v0 = vpop.f32.mrb[6].mxu0 }
 0x101   :  { %v564_v1 = vadd.f32 %v563_v63, %v562_v58  ;;  %v565_v2 = vpop.f32.mrb[6].mxu1  ;;  %v538_v3 = vpop.f32.mrb[7].mxu0 }
 0x102   :  { %v504_v4 = vpack.c.bf16 %v425_v61, %v424_v60  ;;  %v369_v5 = vadd.f32 %v536_v62, %v452_v42  ;;  %v539_v6 = vadd.f32 %v538_v3, %v537_v0  ;;  %v566_v7 = vpop.f32.mrb[7].mxu1 }
 0x103   :  { %v567_v8 = vadd.f32 %v566_v7, %v565_v2 }
 0x104   :  { %505 = vst [vmem:[%s764_s3] sm:$0xff] %v504_v4   ;;  %v418_v9 = vadd.f32 %v564_v1, %v369_v5  ;;  %v372_v10 = vadd.f32 %v539_v6, %v452_v42 }
 0x106   :  { %v421_v11 = vadd.f32 %v567_v8, %v372_v10  ;;  %v426_v12 = vmax.f32 %v418_v9, 0.0 }
 0x108   :  { %v427_v13 = vmax.f32 %v421_v11, 0.0 }
 0x10a   :  { %v509_v14 = vpack.c.bf16 %v427_v13, %v426_v12 }
 0x10c   :  { %511 = vst [vmem:[%s764_s3 + $0x8] sm:$0xff] %v509_v14  }

// kernel: dqn_forward.6
= control target key start
LH: loop header
LB: loop body
LE: loop exit
PB: predicated region body
PF: predicated region fallthrough
CT: control target
= control target key end

     0   :  { %v690_v33 = vmov 0.0   ;;  %vm691_vm0 = vmmov 0   ;;  %s853_s1 = inlined_call_operand.vmem [shape: bf16[640,128], index: 1, kind: input, shape index: {}]   ;;  %s854_s0 = inlined_call_operand.vmem [shape: bf16[16,640], index: 0, kind: input, shape index: {}]   ;;  %s855_s2 = inlined_call_operand.vmem [shape: f32[1,128], index: 2, kind: input, shape index: {}]   ;;  %s856_s3 = inlined_call_operand.vmem [shape: bf16[16,128], index: 3, kind: output, shape index: {}]  }
   0x1   :  { %v643_v0 = vld [vmem:[%s853_s1 + $0x40] sm:$0xff]   ;;  %v647_v4 = vld [vmem:[%s853_s1 + $0x48] sm:$0xff]   ;;  %v651_v8 = vld [vmem:[%s853_s1 + $0x50] sm:$0xff]  }
   0x2   :  { %v644_v1 = vld [vmem:[%s853_s1] sm:$0xff]   ;;  %568 = vmatprep.subr.bf16.mxu0 %v643_v0  ;;  %v648_v5 = vld [vmem:[%s853_s1 + $0x8] sm:$0xff]   ;;  %v652_v9 = vld [vmem:[%s853_s1 + $0x10] sm:$0xff]  }
   0x3   :  { %v645_v2 = vld [vmem:[%s853_s1 + $0xc0] sm:$0xff]   ;;  %569 = vmatpush3.bf16.msra.mxu0 %v644_v1  ;;  %v649_v6 = vld [vmem:[%s853_s1 + $0xc8] sm:$0xff]   ;;  %v653_v10 = vld [vmem:[%s853_s1 + $0xd0] sm:$0xff]  }
   0x4   :  { %v646_v3 = vld [vmem:[%s853_s1 + $0x80] sm:$0xff]   ;;  %590 = vmatprep.subr.bf16.mxu1 %v645_v2  ;;  %570 = vmatprep.subr.bf16.mxu0 %v647_v4  ;;  %v650_v7 = vld [vmem:[%s853_s1 + $0x88] sm:$0xff]   ;;  %v654_v11 = vld [vmem:[%s853_s1 + $0x90] sm:$0xff]  }
   0x5   :  { %591 = vmatpush3.bf16.msra.mxu1 %v646_v3  ;;  %v655_v12 = vld [vmem:[%s853_s1 + $0x58] sm:$0xff]   ;;  %v659_v16 = vld [vmem:[%s853_s1 + $0x60] sm:$0xff]   ;;  %v663_v20 = vld [vmem:[%s853_s1 + $0x68] sm:$0xff]  }
   0x6   :  { %592 = vmatprep.subr.bf16.mxu1 %v649_v6  ;;  %v656_v13 = vld [vmem:[%s853_s1 + $0x18] sm:$0xff]   ;;  %v660_v17 = vld [vmem:[%s853_s1 + $0x20] sm:$0xff]   ;;  %v664_v21 = vld [vmem:[%s853_s1 + $0x28] sm:$0xff]  }
   0x7   :  { %571 = vmatpush3.bf16.msra.mxu0 %v648_v5  ;;  %v657_v14 = vld [vmem:[%s853_s1 + $0xd8] sm:$0xff]   ;;  %v661_v18 = vld [vmem:[%s853_s1 + $0xe0] sm:$0xff]   ;;  %v665_v22 = vld [vmem:[%s853_s1 + $0xe8] sm:$0xff]  }
   0x8   :  { %572 = vmatprep.subr.bf16.mxu0 %v651_v8  ;;  %v658_v15 = vld [vmem:[%s853_s1 + $0x98] sm:$0xff]   ;;  %v662_v19 = vld [vmem:[%s853_s1 + $0xa0] sm:$0xff]   ;;  %v666_v23 = vld [vmem:[%s853_s1 + $0xa8] sm:$0xff]  }
   0x9   :  { %593 = vmatpush3.bf16.msra.mxu1 %v650_v7  ;;  %v667_v24 = vld [vmem:[%s853_s1 + $0x70] sm:$0xff]   ;;  %v671_v28 = vld [vmem:[%s853_s1 + $0x78] sm:$0xff]   ;;  %v680_v36 = vld [vmem:[%s854_s0 + $0xc] ss:$20 sps:$4 sm:$0xff]  }
   0xa   :  { %594 = vmatprep.subr.bf16.mxu1 %v653_v10  ;;  %v668_v25 = vld [vmem:[%s853_s1 + $0x30] sm:$0xff]   ;;  %v672_v29 = vld [vmem:[%s853_s1 + $0x38] sm:$0xff]   ;;  %v681_v37 = vld [vmem:[%s853_s1 + $0x100] sm:$0xff]   ;;  %447 = vmatprep.mubr.bf16.mxu1 %v680_v36 }
   0xb   :  { %573 = vmatpush3.bf16.msra.mxu0 %v652_v9  ;;  %v669_v26 = vld [vmem:[%s853_s1 + $0xf0] sm:$0xff]   ;;  %v673_v30 = vld [vmem:[%s853_s1 + $0xf8] sm:$0xff]   ;;  %v682_v38 = vld [vmem:[%s853_s1 + $0x108] sm:$0xff]  }
   0xc   :  { %574 = vmatprep.subr.bf16.mxu0 %v655_v12  ;;  %v670_v27 = vld [vmem:[%s853_s1 + $0xb0] sm:$0xff]   ;;  %v676_v32 = vld [vmem:[%s854_s0 + $0x4] ss:$20 sps:$4 sm:$0xff]   ;;  %v678_v35 = vld [vmem:[%s854_s0 + $0x8] ss:$20 sps:$4 sm:$0xff]  }
   0xd   :  { %595 = vmatpush3.bf16.msra.mxu1 %v654_v11  ;;  %v674_v31 = vld [vmem:[%s854_s0] ss:$20 sps:$4 sm:$0xff]   ;;  %v677_v34 = vld [vmem:[%s853_s1 + $0xb8] sm:$0xff]   ;;  %406 = vmatprep.mubr.bf16.mxu0 %v676_v32  ;;  %v686_v42 = vld [vmem:[%s853_s1 + $0x128] sm:$0xff]  }
   0xe   :  { %596 = vmatprep.subr.bf16.mxu1 %v657_v14  ;;  %v683_v39 = vld [vmem:[%s853_s1 + $0x110] sm:$0xff]   ;;  %v684_v40 = vld [vmem:[%s853_s1 + $0x118] sm:$0xff]   ;;  %v685_v41 = vld [vmem:[%s853_s1 + $0x120] sm:$0xff]  }
   0xf   :  { %575 = vmatpush3.bf16.msra.mxu0 %v656_v13  ;;  %v687_v43 = vld [vmem:[%s853_s1 + $0x130] sm:$0xff]   ;;  %v688_v44 = vld [vmem:[%s853_s1 + $0x138] sm:$0xff]   ;;  %v513_v47 = vld [vmem:[%s855_s2] ss:$0 sm:$0xff] }
  0x10   :  { %576 = vmatprep.subr.bf16.mxu0 %v659_v16  ;;  %v689_v45 = vld [vmem:[%s854_s0 + $0x10] ss:$20 sps:$4 sm:$0xff]  }
  0x11   :  { %597 = vmatpush3.bf16.msra.mxu1 %v658_v15 }
  0x12   :  { %598 = vmatprep.subr.bf16.mxu1 %v661_v18 }
  0x13   :  { %577 = vmatpush3.bf16.msra.mxu0 %v660_v17 }
  0x14   :  { %578 = vmatprep.subr.bf16.mxu0 %v663_v20 }
  0x15   :  { %599 = vmatpush3.bf16.msra.mxu1 %v662_v19 }
  0x16   :  { %600 = vmatprep.subr.bf16.mxu1 %v665_v22 }
  0x17   :  { %579 = vmatpush3.bf16.msra.mxu0 %v664_v21 }
  0x18   :  { %580 = vmatprep.subr.bf16.mxu0 %v667_v24 }
  0x19   :  { %601 = vmatpush3.bf16.msra.mxu1 %v666_v23 }
  0x1a   :  { %602 = vmatprep.subr.bf16.mxu1 %v669_v26 }
  0x1b   :  { %581 = vmatpush3.bf16.msra.mxu0 %v668_v25 }
  0x1c   :  { %582 = vmatprep.subr.bf16.mxu0 %v671_v28 }
  0x1d   :  { %603 = vmatpush3.bf16.msra.mxu1 %v670_v27 }
  0x1e   :  { %604 = vmatprep.subr.bf16.mxu1 %v673_v30 }
  0x1f   :  { %583 = vmatpush3.bf16.msra.mxu0 %v672_v29 }
  0x20   :  { %621 = vmatprep.subr.bf16.mxu0 %v690_v33 }
  0x21   :  { %605 = vmatpush3.bf16.msra.mxu1 %v677_v34 }
  0x22   :  { %407 = vmatmul.mubr.bf16.vlgmr.msra.gmra.mrb[0].mxu0 %v674_v31 }
  0x23   :  { %637 = vmatprep.mubr.msk.bf16.mxu0 %vm691_vm0, %v690_v33  ;;  %622 = vmatpush3.bf16.msra.mxu0 %v681_v37 }
  0x24   :  { %448 = vmatmul.mubr.bf16.vlgmr.msra.gmra.mrb[0].mxu1 %v678_v35  ;;  %623 = vmatprep.subr.bf16.mxu0 %v690_v33 }
  0x27   :  { %624 = vmatpush3.bf16.msra.mxu0 %v682_v38 }
  0x28   :  { %625 = vmatprep.subr.bf16.mxu0 %v690_v33 }
  0x2b   :  { %626 = vmatpush3.bf16.msra.mxu0 %v683_v39 }
  0x2c   :  { %627 = vmatprep.subr.bf16.mxu0 %v690_v33 }
  0x2f   :  { %628 = vmatpush3.bf16.msra.mxu0 %v684_v40 }
  0x30   :  { %629 = vmatprep.subr.bf16.mxu0 %v690_v33 }
  0x33   :  { %630 = vmatpush3.bf16.msra.mxu0 %v685_v41 }
  0x34   :  { %631 = vmatprep.subr.bf16.mxu0 %v690_v33 }
  0x37   :  { %632 = vmatpush3.bf16.msra.mxu0 %v686_v42 }
  0x38   :  { %633 = vmatprep.subr.bf16.mxu0 %v690_v33 }
  0x3b   :  { %634 = vmatpush3.bf16.msra.mxu0 %v687_v43 }
  0x3c   :  { %635 = vmatprep.subr.bf16.mxu0 %v690_v33 }
  0x3f   :  { %636 = vmatpush3.bf16.msra.mxu0 %v688_v44 }
  0x42   :  { %638 = vmatmul.mubr.bf16.vlgmr.msra.gmra.mrb[4].mxu0 %v689_v45 }
  0xf5   :  { %v584_v46 = vpop.f32.mrb[0].mxu0 }
  0xf6   :  { %v585_v48 = vpop.f32.mrb[1].mxu0 }
  0xf7   :  { %v586_v49 = vadd.f32 %v585_v48, %v584_v46  ;;  %v587_v50 = vpop.f32.mrb[2].mxu0  ;;  %v606_v51 = vpop.f32.mrb[0].mxu1 }
  0xf8   :  { %v588_v52 = vpop.f32.mrb[3].mxu0  ;;  %v607_v55 = vpop.f32.mrb[1].mxu1 }
  0xf9   :  { %v409_v53 = vadd.f32 %v586_v49, %v513_v47  ;;  %v589_v54 = vadd.f32 %v588_v52, %v587_v50  ;;  %v608_v56 = vadd.f32 %v607_v55, %v606_v51  ;;  %v609_v57 = vpop.f32.mrb[2].mxu1 }
  0xfa   :  { %v610_v59 = vpop.f32.mrb[3].mxu1 }
  0xfb   :  { %v412_v58 = vadd.f32 %v589_v54, %v513_v47  ;;  %v611_v60 = vadd.f32 %v610_v59, %v609_v57  ;;  %v450_v61 = vadd.f32 %v608_v56, %v409_v53 }
  0xfd   :  { %v453_v62 = vadd.f32 %v611_v60, %v412_v58 }
 0x115   :  { %v490_v63 = vpop.f32.mrb[4].mxu0 }
 0x116   :  { %v491_v0 = vadd.f32 %v490_v63, %v450_v61  ;;  %v639_v1 = vpop.f32.mrb[5].mxu0 }
 0x117   :  { %v493_v2 = vpop.f32.mrb[6].mxu0 }
 0x118   :  { %v494_v3 = vadd.f32 %v493_v2, %v453_v62  ;;  %v640_v4 = vpop.f32.mrb[7].mxu0  ;;  %v497_v5 = vmax.f32 %v491_v0, 0.0 }
 0x11a   :  { %v498_v6 = vmax.f32 %v494_v3, 0.0 }
 0x11c   :  { %v566_v7 = vpack.c.bf16 %v498_v6, %v497_v5 }
 0x11e   :  { %567 = vst [vmem:[%s856_s3] sm:$0xff] %v566_v7  }

// kernel: dqn_forward.7
= control target key start
LH: loop header
LB: loop body
LE: loop exit
PB: predicated region body
PF: predicated region fallthrough
CT: control target
= control target key end

     0   :  { %v931_v1 = vmov 0   ;;  %s1169_s1 = inlined_call_operand.vmem [shape: bf16[128,512], index: 1, kind: input, shape index: {}]   ;;  %s1170_s0 = inlined_call_operand.vmem [shape: bf16[16,128], index: 0, kind: input, shape index: {}]   ;;  %s1171_s3 = inlined_call_operand.vmem [shape: bf16[512,128], index: 3, kind: input, shape index: {}]   ;;  %s1172_s2 = inlined_call_operand.vmem [shape: f32[1,512], index: 2, kind: input, shape index: {}]   ;;  %s1173_s4 = inlined_call_operand.vmem [shape: f32[1,128], index: 4, kind: input, shape index: {}]   ;;  %s1174_s5 = inlined_call_operand.vmem [shape: f32[16,128], index: 5, kind: output, shape index: {}]  }
   0x1   :  { %v850_v0 = vld [vmem:[%s1169_s1 + $0x4] ss:$16 sps:$4 sm:$0xff]   ;;  %295 = vmatprep.mubr.bf16.mxu0 %v931_v1  ;;  %338 = vmatprep.mubr.bf16.mxu1 %v931_v1  ;;  %v852_v2 = vld [vmem:[%s1169_s1 + $0xc] ss:$16 sps:$4 sm:$0xff]   ;;  %v854_v3 = vld [vmem:[%s1169_s1] ss:$16 sps:$4 sm:$0xff]  }
   0x2   :  { %263 = vmatprep.subr.bf16.mxu0 %v850_v0  ;;  %v855_v4 = vld [vmem:[%s1169_s1 + $0x8] ss:$16 sps:$4 sm:$0xff]   ;;  %306 = vmatprep.subr.bf16.mxu1 %v852_v2  ;;  %v856_v5 = vld [vmem:[%s1169_s1 + $0x24] ss:$16 sps:$4 sm:$0xff]   ;;  %v858_v6 = vld [vmem:[%s1169_s1 + $0x2c] ss:$16 sps:$4 sm:$0xff]   ;;  %v27_v2 = vlaneseq }
   0x3   :  { %264 = vmatpush1.bf16.msra.mxu0 %v854_v3  ;;  %307 = vmatpush1.bf16.msra.mxu1 %v855_v4  ;;  %v860_v7 = vld [vmem:[%s1169_s1 + $0x20] ss:$16 sps:$4 sm:$0xff]   ;;  %v861_v8 = vld [vmem:[%s1169_s1 + $0x28] ss:$16 sps:$4 sm:$0xff]   ;;  %v862_v9 = vld [vmem:[%s1169_s1 + $0x44] ss:$16 sps:$4 sm:$0xff]  }
   0x4   :  { %265 = vmatprep.subr.bf16.mxu0 %v856_v5  ;;  %308 = vmatprep.subr.bf16.mxu1 %v858_v6  ;;  %v864_v10 = vld [vmem:[%s1169_s1 + $0x4c] ss:$16 sps:$4 sm:$0xff]   ;;  %v866_v11 = vld [vmem:[%s1169_s1 + $0x40] ss:$16 sps:$4 sm:$0xff]   ;;  %v867_v12 = vld [vmem:[%s1169_s1 + $0x48] ss:$16 sps:$4 sm:$0xff]  }
   0x5   :  { %v868_v13 = vld [vmem:[%s1169_s1 + $0x64] ss:$16 sps:$4 sm:$0xff]   ;;  %v870_v14 = vld [vmem:[%s1169_s1 + $0x6c] ss:$16 sps:$4 sm:$0xff]   ;;  %v872_v15 = vld [vmem:[%s1169_s1 + $0x60] ss:$16 sps:$4 sm:$0xff]  }
   0x6   :  { %v873_v16 = vld [vmem:[%s1169_s1 + $0x68] ss:$16 sps:$4 sm:$0xff]   ;;  %v874_v17 = vld [vmem:[%s1169_s1 + $0x84] ss:$16 sps:$4 sm:$0xff]   ;;  %v876_v18 = vld [vmem:[%s1169_s1 + $0x8c] ss:$16 sps:$4 sm:$0xff]  }
   0x7   :  { %266 = vmatpush1.bf16.msra.mxu0 %v860_v7  ;;  %309 = vmatpush1.bf16.msra.mxu1 %v861_v8  ;;  %v878_v19 = vld [vmem:[%s1169_s1 + $0x80] ss:$16 sps:$4 sm:$0xff]   ;;  %v879_v20 = vld [vmem:[%s1169_s1 + $0x88] ss:$16 sps:$4 sm:$0xff]   ;;  %v880_v21 = vld [vmem:[%s1169_s1 + $0xa4] ss:$16 sps:$4 sm:$0xff]  }
   0x8   :  { %267 = vmatprep.subr.bf16.mxu0 %v862_v9  ;;  %310 = vmatprep.subr.bf16.mxu1 %v864_v10  ;;  %v882_v22 = vld [vmem:[%s1169_s1 + $0xac] ss:$16 sps:$4 sm:$0xff]   ;;  %v884_v23 = vld [vmem:[%s1169_s1 + $0xa0] ss:$16 sps:$4 sm:$0xff]   ;;  %v885_v24 = vld [vmem:[%s1169_s1 + $0xa8] ss:$16 sps:$4 sm:$0xff]  }
   0x9   :  { %v886_v25 = vld [vmem:[%s1169_s1 + $0xc4] ss:$16 sps:$4 sm:$0xff]   ;;  %v888_v26 = vld [vmem:[%s1169_s1 + $0xcc] ss:$16 sps:$4 sm:$0xff]   ;;  %v890_v27 = vld [vmem:[%s1169_s1 + $0xc0] ss:$16 sps:$4 sm:$0xff]  }
   0xa   :  { %v891_v28 = vld [vmem:[%s1169_s1 + $0xc8] ss:$16 sps:$4 sm:$0xff]   ;;  %v892_v29 = vld [vmem:[%s1169_s1 + $0xe4] ss:$16 sps:$4 sm:$0xff]   ;;  %v894_v30 = vld [vmem:[%s1169_s1 + $0xec] ss:$16 sps:$4 sm:$0xff]  }
   0xb   :  { %268 = vmatpush1.bf16.msra.mxu0 %v866_v11  ;;  %311 = vmatpush1.bf16.msra.mxu1 %v867_v12  ;;  %v896_v31 = vld [vmem:[%s1169_s1 + $0xe0] ss:$16 sps:$4 sm:$0xff]   ;;  %v897_v32 = vld [vmem:[%s1169_s1 + $0xe8] ss:$16 sps:$4 sm:$0xff]   ;;  %v28_v3 = vshrl.u32 %v27_v2, 7 }
   0xc   :  { %269 = vmatprep.subr.bf16.mxu0 %v868_v13  ;;  %312 = vmatprep.subr.bf16.mxu1 %v870_v14  ;;  %v899_v33 = vld [vmem:[%s1171_s3 + $0x40] sm:$0xff]   ;;  %v903_v38 = vld [vmem:[%s1171_s3 + $0x48] sm:$0xff]   ;;  %v907_v42 = vld [vmem:[%s1171_s3 + $0x50] sm:$0xff]  }
   0xd   :  { %v898_v34 = vld [vmem:[%s1170_s0] sm:$0xff]   ;;  %v904_v39 = vld [vmem:[%s1171_s3 + $0xc8] sm:$0xff]   ;;  %v908_v43 = vld [vmem:[%s1171_s3 + $0xd0] sm:$0xff]   ;;  %v29_v4 = vsub.s32 0, %v28_v3  ;;  %v37_v5 = vsub.s32 2, %v28_v3  ;;  %v33_v7 = vsub.s32 1, %v28_v3 }
   0xe   :  { %v900_v35 = vld [vmem:[%s1171_s3 + $0xc0] sm:$0xff]   ;;  %v905_v40 = vld [vmem:[%s1171_s3 + $0x8] sm:$0xff]   ;;  %v909_v44 = vld [vmem:[%s1171_s3 + $0x10] sm:$0xff]   ;;  %v41_v8 = vsub.s32 3, %v28_v3 }
   0xf   :  { %270 = vmatpush1.bf16.msra.mxu0 %v872_v15  ;;  %313 = vmatpush1.bf16.msra.mxu1 %v873_v16  ;;  %v901_v36 = vld [vmem:[%s1171_s3] sm:$0xff]   ;;  %v906_v41 = vld [vmem:[%s1171_s3 + $0x88] sm:$0xff]   ;;  %v910_v45 = vld [vmem:[%s1171_s3 + $0x90] sm:$0xff]  }
  0x10   :  { %271 = vmatprep.subr.bf16.mxu0 %v874_v17  ;;  %314 = vmatprep.subr.bf16.mxu1 %v876_v18  ;;  %v902_v37 = vld [vmem:[%s1171_s3 + $0x80] sm:$0xff]   ;;  %v911_v46 = vld [vmem:[%s1171_s3 + $0x58] sm:$0xff]   ;;  %v919_v54 = vld [vmem:[%s1171_s3 + $0x68] sm:$0xff]  }
  0x11   :  { %v912_v47 = vld [vmem:[%s1171_s3 + $0xd8] sm:$0xff]   ;;  %v915_v50 = vld [vmem:[%s1171_s3 + $0x60] sm:$0xff]   ;;  %v920_v55 = vld [vmem:[%s1171_s3 + $0xe8] sm:$0xff]  }
  0x12   :  { %v913_v48 = vld [vmem:[%s1171_s3 + $0x18] sm:$0xff]   ;;  %v916_v51 = vld [vmem:[%s1171_s3 + $0xe0] sm:$0xff]   ;;  %v921_v56 = vld [vmem:[%s1171_s3 + $0x28] sm:$0xff]  }
  0x13   :  { %272 = vmatpush1.bf16.msra.mxu0 %v878_v19  ;;  %315 = vmatpush1.bf16.msra.mxu1 %v879_v20  ;;  %v914_v49 = vld [vmem:[%s1171_s3 + $0x98] sm:$0xff]   ;;  %v917_v52 = vld [vmem:[%s1171_s3 + $0x20] sm:$0xff]   ;;  %v922_v57 = vld [vmem:[%s1171_s3 + $0xa8] sm:$0xff]  }
  0x14   :  { %273 = vmatprep.subr.bf16.mxu0 %v880_v21  ;;  %316 = vmatprep.subr.bf16.mxu1 %v882_v22  ;;  %v918_v53 = vld [vmem:[%s1171_s3 + $0xa0] sm:$0xff]   ;;  %v923_v58 = vld [vmem:[%s1171_s3 + $0x70] sm:$0xff]   ;;  %v927_v62 = vld [vmem:[%s1171_s3 + $0x78] sm:$0xff]  }
  0x15   :  { %v924_v59 = vld [vmem:[%s1171_s3 + $0xf0] sm:$0xff]   ;;  %v928_v63 = vld [vmem:[%s1171_s3 + $0xf8] sm:$0xff]   ;;  %v25_v6 = vld [vmem:[%s1172_s2] sm:$0xf] }
  0x16   :  { %v925_v60 = vld [vmem:[%s1171_s3 + $0x30] sm:$0xff]   ;;  %v929_v0 = vld [vmem:[%s1171_s3 + $0x38] sm:$0xff]   ;;  %v30_v9 = vrot.slane %v25_v6, %v29_v4  ;;  %v38_v10 = vrot.slane %v25_v6, %v37_v5  ;;  %v34_v11 = vrot.slane %v25_v6, %v33_v7  ;;  %v42_v12 = vrot.slane %v25_v6, %v41_v8 }
  0x17   :  { %274 = vmatpush1.bf16.msra.mxu0 %v884_v23  ;;  %317 = vmatpush1.bf16.msra.mxu1 %v885_v24  ;;  %v926_v61 = vld [vmem:[%s1171_s3 + $0xb0] sm:$0xff]   ;;  %v930_v1 = vld [vmem:[%s1171_s3 + $0xb8] sm:$0xff]  }
  0x18   :  { %275 = vmatprep.subr.bf16.mxu0 %v886_v25  ;;  %318 = vmatprep.subr.bf16.mxu1 %v888_v26 }
  0x1b   :  { %276 = vmatpush1.bf16.msra.mxu0 %v890_v27  ;;  %319 = vmatpush1.bf16.msra.mxu1 %v891_v28 }
  0x1c   :  { %277 = vmatprep.subr.bf16.mxu0 %v892_v29  ;;  %320 = vmatprep.subr.bf16.mxu1 %v894_v30 }
  0x1f   :  { %278 = vmatpush1.bf16.msra.mxu0 %v896_v31  ;;  %321 = vmatpush1.bf16.msra.mxu1 %v897_v32 }
  0x20   :  { %805 = vmatprep.subr.bf16.mxu0 %v899_v33  ;;  %827 = vmatprep.subr.bf16.mxu1 %v900_v35 }
  0x22   :  { %296 = vmatmul.mubr.bf16.vlgmr.msra.gmra.mrb[0].mxu0 %v898_v34  ;;  %339 = vmatmul.mubr.bf16.vlgmr.msra.gmra.mrb[0].mxu1 %v898_v34 }
  0x23   :  { %806 = vmatpush3.bf16.msra.mxu0 %v901_v36  ;;  %828 = vmatpush3.bf16.msra.mxu1 %v902_v37 }
  0x24   :  { %807 = vmatprep.subr.bf16.mxu0 %v903_v38  ;;  %829 = vmatprep.subr.bf16.mxu1 %v904_v39 }
  0x27   :  { %808 = vmatpush3.bf16.msra.mxu0 %v905_v40  ;;  %830 = vmatpush3.bf16.msra.mxu1 %v906_v41 }
  0x28   :  { %809 = vmatprep.subr.bf16.mxu0 %v907_v42  ;;  %831 = vmatprep.subr.bf16.mxu1 %v908_v43  ;;  %v772_v43 = vld [vmem:[%s1173_s4] ss:$0 sm:$0xff] }
  0x2b   :  { %810 = vmatpush3.bf16.msra.mxu0 %v909_v44  ;;  %832 = vmatpush3.bf16.msra.mxu1 %v910_v45 }
  0x2c   :  { %811 = vmatprep.subr.bf16.mxu0 %v911_v46  ;;  %833 = vmatprep.subr.bf16.mxu1 %v912_v47 }
  0x2f   :  { %812 = vmatpush3.bf16.msra.mxu0 %v913_v48  ;;  %834 = vmatpush3.bf16.msra.mxu1 %v914_v49 }
  0x30   :  { %813 = vmatprep.subr.bf16.mxu0 %v915_v50  ;;  %835 = vmatprep.subr.bf16.mxu1 %v916_v51 }
  0x33   :  { %814 = vmatpush3.bf16.msra.mxu0 %v917_v52  ;;  %836 = vmatpush3.bf16.msra.mxu1 %v918_v53 }
  0x34   :  { %815 = vmatprep.subr.bf16.mxu0 %v919_v54  ;;  %837 = vmatprep.subr.bf16.mxu1 %v920_v55 }
  0x37   :  { %816 = vmatpush3.bf16.msra.mxu0 %v921_v56  ;;  %838 = vmatpush3.bf16.msra.mxu1 %v922_v57 }
  0x38   :  { %817 = vmatprep.subr.bf16.mxu0 %v923_v58  ;;  %839 = vmatprep.subr.bf16.mxu1 %v924_v59 }
  0x3b   :  { %818 = vmatpush3.bf16.msra.mxu0 %v925_v60  ;;  %840 = vmatpush3.bf16.msra.mxu1 %v926_v61 }
  0x3c   :  { %819 = vmatprep.subr.bf16.mxu0 %v927_v62  ;;  %841 = vmatprep.subr.bf16.mxu1 %v928_v63 }
  0x3f   :  { %820 = vmatpush3.bf16.msra.mxu0 %v929_v0  ;;  %842 = vmatpush3.bf16.msra.mxu1 %v930_v1 }
  0xf5   :  { %v297_v13 = vpop.f32.mrb[0].mxu0  ;;  %v340_v14 = vpop.f32.mrb[0].mxu1 }
  0xf6   :  { %v349_v15 = vadd.f32 %v297_v13, %v30_v9  ;;  %v351_v16 = vadd.f32 %v340_v14, %v38_v10  ;;  %v299_v17 = vpop.f32.mrb[1].mxu0  ;;  %v342_v18 = vpop.f32.mrb[1].mxu1 }
  0xf7   :  { %v350_v19 = vadd.f32 %v299_v17, %v34_v11  ;;  %v352_v20 = vadd.f32 %v342_v18, %v42_v12  ;;  %v301_v21 = vpop.f32.mrb[2].mxu0  ;;  %v344_v22 = vpop.f32.mrb[2].mxu1 }
  0xf8   :  { %v378_v23 = vmax.f32 %v351_v16, 0.0  ;;  %v353_v24 = vadd.f32 %v301_v21, %v30_v9  ;;  %v355_v25 = vadd.f32 %v344_v22, %v38_v10  ;;  %v303_v26 = vpop.f32.mrb[3].mxu0  ;;  %v346_v27 = vpop.f32.mrb[3].mxu1  ;;  %v376_v31 = vmax.f32 %v349_v15, 0.0 }
  0xf9   :  { %v379_v28 = vmax.f32 %v352_v20, 0.0  ;;  %v354_v29 = vadd.f32 %v303_v26, %v34_v11  ;;  %v356_v30 = vadd.f32 %v346_v27, %v42_v12  ;;  %v377_v34 = vmax.f32 %v350_v19, 0.0 }
  0xfa   :  { %v380_v32 = vmax.f32 %v353_v24, 0.0  ;;  %v382_v33 = vmax.f32 %v355_v25, 0.0 }
  0xfb   :  { %v381_v35 = vmax.f32 %v354_v29, 0.0  ;;  %v383_v36 = vmax.f32 %v356_v30, 0.0 }
  0xfc   :  { %v384_v37 = vpack.c.bf16 %v380_v32, %v376_v31  ;;  %v386_v38 = vpack.c.bf16 %v382_v33, %v378_v23 }
  0xfd   :  { %v385_v39 = vpack.c.bf16 %v381_v35, %v377_v34  ;;  %v387_v40 = vpack.c.bf16 %v383_v36, %v379_v28 }
  0xff   :  { %683 = vmatprep.mubr.bf16.mxu0 %v385_v39  ;;  %724 = vmatprep.mubr.bf16.mxu1 %v387_v40 }
 0x100   :  { %684 = vmatmul.mubr.bf16.vlgmr.msra.gmra.mrb[4].mxu0 %v384_v37  ;;  %725 = vmatmul.mubr.bf16.vlgmr.msra.gmra.mrb[4].mxu1 %v386_v38 }
 0x1d3   :  { %v821_v41 = vpop.f32.mrb[4].mxu0  ;;  %v843_v42 = vpop.f32.mrb[4].mxu1 }
 0x1d4   :  { %v822_v44 = vpop.f32.mrb[5].mxu0  ;;  %v844_v45 = vpop.f32.mrb[5].mxu1 }
 0x1d5   :  { %v823_v46 = vadd.f32 %v822_v44, %v821_v41  ;;  %v845_v47 = vadd.f32 %v844_v45, %v843_v42  ;;  %v824_v48 = vpop.f32.mrb[6].mxu0  ;;  %v846_v49 = vpop.f32.mrb[6].mxu1 }
 0x1d6   :  { %v825_v50 = vpop.f32.mrb[7].mxu0  ;;  %v847_v51 = vpop.f32.mrb[7].mxu1 }
 0x1d7   :  { %v686_v52 = vadd.f32 %v823_v46, %v772_v43  ;;  %v826_v53 = vadd.f32 %v825_v50, %v824_v48  ;;  %v848_v54 = vadd.f32 %v847_v51, %v846_v49 }
 0x1d9   :  { %v727_v55 = vadd.f32 %v845_v47, %v686_v52  ;;  %v689_v56 = vadd.f32 %v826_v53, %v772_v43 }
 0x1db   :  { %733 = vst [vmem:[%s1174_s5] sm:$0xff] %v727_v55  ;;  %v730_v57 = vadd.f32 %v848_v54, %v689_v56 }
 0x1dd   :  { %734 = vst [vmem:[%s1174_s5 + $0x8] sm:$0xff] %v730_v57 }

</bundles_post_ra>
